<compile_context>
chip_gen: v7x
topology: tpu7x:2x2x1
jax: 0.10.0
libtpu: 0.0.40
codegen_flags: <defaults>
</compile_context>

<pallas_src>
import functools

import jax
import jax.numpy as jnp
import numpy as np
from jax.experimental import pallas as pl
from jax.experimental.pallas import tpu as pltpu


def _shortcut_conv3x3_kernel(xm_ref, xt_ref, xb_ref, w_ref, b_ref, o_ref,
                             xpad_ref, *, TH, W, C, compute_dtype):
    """One row-tile step of  out = x + conv3x3(x) + bias  (NHWC).

    xm_ref   : (1, TH, W, C)   input row tile (also the residual branch)
    xt_ref   : (1, 1,  W, C)   row just above the tile (clamped; masked at t == 0)
    xb_ref   : (1, 1,  W, C)   row just below the tile (clamped; masked at t == T-1)
    w_ref    : (3, 3*C, C)     fused weights, w[dy, dx*C + cin, cout]  (compute dtype)
    b_ref    : (1, C)          bias
    o_ref    : (1, TH, W, C)   output tile
    xpad_ref : (TH+2, W+2, C)  VMEM scratch holding the zero-padded conv input
    """
    t = pl.program_id(1)
    n_tiles = pl.num_programs(1)

    # Rebuild the zero-padded tile in VMEM (no HBM pad pass, one input stream).
    xpad_ref[...] = jnp.zeros_like(xpad_ref)
    xpad_ref[1:TH + 1, 1:W + 1, :] = xm_ref[0]

    @pl.when(t > 0)
    def _():                                      # top 1-row halo
        xpad_ref[0:1, 1:W + 1, :] = xt_ref[0]

    @pl.when(t < n_tiles - 1)
    def _():                                      # bottom 1-row halo
        xpad_ref[TH + 1:TH + 2, 1:W + 1, :] = xb_ref[0]

    # Residual + bias folded into the f32 accumulator init.
    acc = (xm_ref[0].reshape(TH * W, C).astype(jnp.float32)
           + b_ref[...].astype(jnp.float32))

    # 3x3 cross-correlation as 3 MXU matmuls with fused K = 3*C
    # (bf16 operands, f32 accumulation).
    for dy in range(3):
        slab = jnp.concatenate(
            [xpad_ref[dy:dy + TH, dx:dx + W, :].astype(compute_dtype)
             for dx in range(3)],
            axis=-1)                              # (TH, W, 3*C)
        acc += jnp.dot(slab.reshape(TH * W, 3 * C), w_ref[dy],
                       preferred_element_type=jnp.float32)

    o_ref[0] = acc.reshape(TH, W, C).astype(o_ref.dtype)


def _pick_row_tile(H, W, C, itemsize, vmem_budget_bytes=8 * 1024 * 1024):
    """Largest divisor of H whose per-step VMEM footprint fits the budget."""
    best = 1
    for th in range(1, H + 1):
        if H % th:
            continue
        scratch = (th + 2) * (W + 2) * C * itemsize      # padded VMEM tile
        io = 2 * 2 * th * W * C * itemsize               # in + out, double-buffered
        halo = 2 * 2 * 1 * W * C * itemsize              # two 1-row halo streams
        slab = th * W * 3 * C * 2                        # bf16 fused-K slab
        acc = th * W * C * 4                             # f32 accumulator
        if scratch + io + halo + slab + acc <= vmem_budget_bytes:
            best = th
    return best


def shortcut_block_nhwc(x_nhwc, w_hwio, b, *, row_tile=None,
                        compute_dtype=jnp.bfloat16):
    """x_nhwc: (N, H, W, C); w_hwio: (3, 3, C, C); b: (C,)."""
    N, H, W, C = x_nhwc.shape
    itemsize = jnp.dtype(x_nhwc.dtype).itemsize
    if row_tile is None:
        row_tile = _pick_row_tile(H, W, C, itemsize)
    if H % row_tile != 0:
        raise ValueError(f"row_tile={row_tile} must divide H={H}")
    T = H // row_tile
    TH = row_tile

    # Fused, lane-dense weight layout: (kh, kw, Cin, Cout) -> (3, 3*C, C),
    # rows ordered kw-major then Cin -> matches the dx-concatenated slab.
    w_fused = w_hwio.reshape(3, 3 * C, C).astype(compute_dtype)
    b2 = b.reshape(1, C)

    kernel = functools.partial(_shortcut_conv3x3_kernel,
                               TH=TH, W=W, C=C, compute_dtype=compute_dtype)

    return pl.pallas_call(
        kernel,
        out_shape=jax.ShapeDtypeStruct((N, H, W, C), x_nhwc.dtype),
        grid_spec=pltpu.PrefetchScalarGridSpec(
            num_scalar_prefetch=0,
            grid=(N, T),
            in_specs=[
                # main row tile (also the residual)
                pl.BlockSpec((1, TH, W, C), lambda n, t: (n, t, 0, 0)),
                # 1-row halos (block row size 1 -> block index == element row),
                # clamped at the image borders; masked inside the kernel.
                pl.BlockSpec((1, 1, W, C),
                             lambda n, t: (n, jnp.maximum(t * TH - 1, 0), 0, 0)),
                pl.BlockSpec((1, 1, W, C),
                             lambda n, t: (n, jnp.minimum(t * TH + TH, H - 1), 0, 0)),
                pl.BlockSpec((3, 3 * C, C), lambda n, t: (0, 0, 0)),
                pl.BlockSpec((1, C), lambda n, t: (0, 0)),
            ],
            out_specs=pl.BlockSpec((1, TH, W, C), lambda n, t: (n, t, 0, 0)),
            scratch_shapes=[pltpu.VMEM((TH + 2, W + 2, C), x_nhwc.dtype)],
        ),
        compiler_params=pltpu.CompilerParams(
            dimension_semantics=("parallel", "parallel"),
            vmem_limit_bytes=32 * 1024 * 1024),
    )(x_nhwc, x_nhwc, x_nhwc, w_fused, b2)


def shortcut_block_nchw(x_nchw, w_oihw, b, *, row_tile=None,
                        compute_dtype=jnp.bfloat16):
    """PyTorch-facing wrapper: NCHW input, Conv2d weight layout (O, I, kH, kW)."""
    x_nhwc = jnp.transpose(x_nchw, (0, 2, 3, 1))
    # PyTorch Conv2d does cross-correlation; no kernel flip. (O,I,kH,kW)->(kH,kW,I,O)
    w_hwio = jnp.transpose(w_oihw, (2, 3, 1, 0))
    y_nhwc = shortcut_block_nhwc(x_nhwc, w_hwio, b,
                                 row_tile=row_tile, compute_dtype=compute_dtype)
    return jnp.transpose(y_nhwc, (0, 3, 1, 2))


def _reference_nchw(x_nchw, w_oihw, b, compute_dtype=jnp.bfloat16):
    # Matched numerics: conv operands rounded to the kernel's compute dtype,
    # f32 accumulation; residual and bias kept in f32.
    xc = x_nchw.astype(compute_dtype).astype(jnp.float32)
    wc = w_oihw.astype(compute_dtype).astype(jnp.float32)
    conv = jax.lax.conv_general_dilated(
        xc, wc, window_strides=(1, 1), padding="SAME",
        dimension_numbers=("NCHW", "OIHW", "NCHW"),
        precision=jax.lax.Precision.HIGHEST)
    return x_nchw + conv + b.reshape(1, -1, 1, 1)


if __name__ == "__main__":
    key = jax.random.PRNGKey(0)
    kx, kw, kb = jax.random.split(key, 3)

    N, C, H, Wd = 2, 4, 16, 16
    x = jax.random.normal(kx, (N, C, H, Wd), dtype=jnp.float32)
    # Deterministic "Conv2d(C, C, 3, padding=1)" parameters (fan-in scaled).
    w = jax.random.normal(kw, (C, C, 3, 3), dtype=jnp.float32) * (1.0 / np.sqrt(C * 9))
    b = jax.random.normal(kb, (C,), dtype=jnp.float32) * 0.1

    ref = _reference_nchw(x, w, b)

    # Auto-picked row tile (whole image at this tiny size).
    out_auto = jax.block_until_ready(shortcut_block_nchw(x, w, b))
    np.testing.assert_allclose(np.asarray(out_auto), np.asarray(ref),
                               rtol=1e-4, atol=1e-4)

    # Forced small row tile: exercises the row-tiled grid + halo masking paths.
    out_tiled = jax.block_until_ready(shortcut_block_nchw(x, w, b, row_tile=4))
    np.testing.assert_allclose(np.asarray(out_tiled), np.asarray(ref),
                               rtol=1e-4, atol=1e-4)

    print("KERNEL_OK")
</pallas_src>

<mosaic_0001>
module attributes {stable_mosaic.version = 11 : i64} {
  func.func @_shortcut_conv3x3_kernel(%arg0: i32, %arg1: i32, %arg2: memref<1x16x16x4xf32, #tpu.memory_space<vmem>>, %arg3: memref<1x1x16x4xf32, #tpu.memory_space<vmem>>, %arg4: memref<1x1x16x4xf32, #tpu.memory_space<vmem>>, %arg5: memref<3x12x4xbf16, #tpu.memory_space<vmem>>, %arg6: memref<1x4xf32, #tpu.memory_space<vmem>>, %arg7: memref<1x16x16x4xf32, #tpu.memory_space<vmem>>, %arg8: memref<18x18x4xf32, #tpu.memory_space<vmem>>) attributes {dimension_semantics = [#tpu.dimension_semantics<parallel>, #tpu.dimension_semantics<parallel>], iteration_bounds = array<i64: 2, 1>, scalar_prefetch = 0 : i64, scratch_operands = 1 : i64, tpu.core_type = #tpu.core_type<tc>, window_params = [{transform_indices = @transform_0, window_bounds = array<i64: 1, 16, 16, 4>}, {transform_indices = @transform_1, window_bounds = array<i64: 1, 1, 16, 4>}, {transform_indices = @transform_2, window_bounds = array<i64: 1, 1, 16, 4>}, {pipeline_mode = #tpu.pipeline_mode<synchronous>, transform_indices = @transform_3, window_bounds = array<i64: 3, 12, 4>}, {pipeline_mode = #tpu.pipeline_mode<synchronous>, transform_indices = @transform_4, window_bounds = array<i64: 1, 4>}, {transform_indices = @transform_5, window_bounds = array<i64: 1, 16, 16, 4>}]} {
    %cst = arith.constant 0.000000e+00 : f32
    %0 = vector.broadcast %cst : f32 to vector<18x18x4xf32>
    %c0 = arith.constant 0 : index
    %c0_0 = arith.constant 0 : index
    %c0_1 = arith.constant 0 : index
    %1 = vector.load %arg8[%c0, %c0_0, %c0_1] : memref<18x18x4xf32, #tpu.memory_space<vmem>>, vector<18x18x4xf32>
    tpu.vector_store %arg8[%c0, %c0_0, %c0_1], %0 {strides = array<i32>} : memref<18x18x4xf32, #tpu.memory_space<vmem>>, vector<18x18x4xf32>,
    %c0_2 = arith.constant 0 : index
    %c0_3 = arith.constant 0 : index
    %c0_4 = arith.constant 0 : index
    %c0_5 = arith.constant 0 : index
    %2 = vector.load %arg2[%c0_2, %c0_3, %c0_4, %c0_5] : memref<1x16x16x4xf32, #tpu.memory_space<vmem>>, vector<1x16x16x4xf32>
    %3 = vector.shape_cast %2 : vector<1x16x16x4xf32> to vector<16x16x4xf32>
    %c1 = arith.constant 1 : index
    %c1_6 = arith.constant 1 : index
    %c0_7 = arith.constant 0 : index
    %4 = vector.load %arg8[%c1, %c1_6, %c0_7] : memref<18x18x4xf32, #tpu.memory_space<vmem>>, vector<16x16x4xf32>
    tpu.vector_store %arg8[%c1, %c1_6, %c0_7], %3 {strides = array<i32>} : memref<18x18x4xf32, #tpu.memory_space<vmem>>, vector<16x16x4xf32>,
    %c0_i32 = arith.constant 0 : i32
    %5 = arith.cmpi sgt, %arg1, %c0_i32 : i32
    %6 = arith.extui %5 : i1 to i32
    %c0_i32_8 = arith.constant 0 : i32
    %7 = arith.cmpi ne, %6, %c0_i32_8 : i32
    scf.if %7 {
      %c0_59 = arith.constant 0 : index
      %c0_60 = arith.constant 0 : index
      %c0_61 = arith.constant 0 : index
      %c0_62 = arith.constant 0 : index
      %57 = vector.load %arg3[%c0_59, %c0_60, %c0_61, %c0_62] : memref<1x1x16x4xf32, #tpu.memory_space<vmem>>, vector<1x1x16x4xf32>
      %58 = vector.shape_cast %57 : vector<1x1x16x4xf32> to vector<1x16x4xf32>
      %c0_63 = arith.constant 0 : index
      %c1_64 = arith.constant 1 : index
      %c0_65 = arith.constant 0 : index
      %59 = vector.load %arg8[%c0_63, %c1_64, %c0_65] : memref<18x18x4xf32, #tpu.memory_space<vmem>>, vector<1x16x4xf32>
      tpu.vector_store %arg8[%c0_63, %c1_64, %c0_65], %58 {strides = array<i32>} : memref<18x18x4xf32, #tpu.memory_space<vmem>>, vector<1x16x4xf32>,
    } else {
    }
    %c0_i32_9 = arith.constant 0 : i32
    %8 = arith.cmpi slt, %arg1, %c0_i32_9 : i32
    %9 = arith.extui %8 : i1 to i32
    %c0_i32_10 = arith.constant 0 : i32
    %10 = arith.cmpi ne, %9, %c0_i32_10 : i32
    scf.if %10 {
      %c0_59 = arith.constant 0 : index
      %c0_60 = arith.constant 0 : index
      %c0_61 = arith.constant 0 : index
      %c0_62 = arith.constant 0 : index
      %57 = vector.load %arg4[%c0_59, %c0_60, %c0_61, %c0_62] : memref<1x1x16x4xf32, #tpu.memory_space<vmem>>, vector<1x1x16x4xf32>
      %58 = vector.shape_cast %57 : vector<1x1x16x4xf32> to vector<1x16x4xf32>
      %c17 = arith.constant 17 : index
      %c1_63 = arith.constant 1 : index
      %c0_64 = arith.constant 0 : index
      %59 = vector.load %arg8[%c17, %c1_63, %c0_64] : memref<18x18x4xf32, #tpu.memory_space<vmem>>, vector<1x16x4xf32>
      tpu.vector_store %arg8[%c17, %c1_63, %c0_64], %58 {strides = array<i32>} : memref<18x18x4xf32, #tpu.memory_space<vmem>>, vector<1x16x4xf32>,
    } else {
    }
    %c0_11 = arith.constant 0 : index
    %c0_12 = arith.constant 0 : index
    %c0_13 = arith.constant 0 : index
    %c0_14 = arith.constant 0 : index
    %11 = vector.load %arg2[%c0_11, %c0_12, %c0_13, %c0_14] : memref<1x16x16x4xf32, #tpu.memory_space<vmem>>, vector<1x16x16x4xf32>
    %12 = vector.shape_cast %11 : vector<1x16x16x4xf32> to vector<16x16x4xf32>
    %13 = vector.shape_cast %12 : vector<16x16x4xf32> to vector<256x4xf32>
    %c0_15 = arith.constant 0 : index
    %c0_16 = arith.constant 0 : index
    %14 = vector.load %arg6[%c0_15, %c0_16] : memref<1x4xf32, #tpu.memory_space<vmem>>, vector<1x4xf32>
    %15 = vector.broadcast %14 : vector<1x4xf32> to vector<256x4xf32>
    %16 = arith.addf %13, %15 : vector<256x4xf32>
    %c0_17 = arith.constant 0 : index
    %c0_18 = arith.constant 0 : index
    %c0_19 = arith.constant 0 : index
    %17 = vector.load %arg8[%c0_17, %c0_18, %c0_19] : memref<18x18x4xf32, #tpu.memory_space<vmem>>, vector<16x16x4xf32>
    %18 = arith.truncf %17 : vector<16x16x4xf32> to vector<16x16x4xbf16>
    %c0_20 = arith.constant 0 : index
    %c1_21 = arith.constant 1 : index
    %c0_22 = arith.constant 0 : index
    %19 = vector.load %arg8[%c0_20, %c1_21, %c0_22] : memref<18x18x4xf32, #tpu.memory_space<vmem>>, vector<16x16x4xf32>
    %20 = arith.truncf %19 : vector<16x16x4xf32> to vector<16x16x4xbf16>
    %c0_23 = arith.constant 0 : index
    %c2 = arith.constant 2 : index
    %c0_24 = arith.constant 0 : index
    %21 = vector.load %arg8[%c0_23, %c2, %c0_24] : memref<18x18x4xf32, #tpu.memory_space<vmem>>, vector<16x16x4xf32>
    %22 = arith.truncf %21 : vector<16x16x4xf32> to vector<16x16x4xbf16>
    %23 = tpu.concatenate %18, %20, %22 in 2 : vector<16x16x4xbf16>, vector<16x16x4xbf16>, vector<16x16x4xbf16> -> vector<16x16x12xbf16>
    %24 = vector.shape_cast %23 : vector<16x16x12xbf16> to vector<256x12xbf16>
    %c0_25 = arith.constant 0 : index
    %c0_26 = arith.constant 0 : index
    %c0_27 = arith.constant 0 : index
    %25 = vector.load %arg5[%c0_25, %c0_26, %c0_27] : memref<3x12x4xbf16, #tpu.memory_space<vmem>>, vector<1x12x4xbf16>
    %26 = vector.shape_cast %25 : vector<1x12x4xbf16> to vector<12x4xbf16>
    %cst_28 = arith.constant dense<0.000000e+00> : vector<256x4xf32>
    %27 = tpu.matmul %24, %26, %cst_28 {dimension_numbers = #tpu.dot_dimension_numbers<[1], [0], [0], [1], [0, 0, 1, 1], [], []>} : vector<256x12xbf16>, vector<12x4xbf16>, vector<256x4xf32> -> vector<256x4xf32>
    %28 = arith.addf %16, %27 : vector<256x4xf32>
    %c1_29 = arith.constant 1 : index
    %c0_30 = arith.constant 0 : index
    %c0_31 = arith.constant 0 : index
    %29 = vector.load %arg8[%c1_29, %c0_30, %c0_31] : memref<18x18x4xf32, #tpu.memory_space<vmem>>, vector<16x16x4xf32>
    %30 = arith.truncf %29 : vector<16x16x4xf32> to vector<16x16x4xbf16>
    %c1_32 = arith.constant 1 : index
    %c1_33 = arith.constant 1 : index
    %c0_34 = arith.constant 0 : index
    %31 = vector.load %arg8[%c1_32, %c1_33, %c0_34] : memref<18x18x4xf32, #tpu.memory_space<vmem>>, vector<16x16x4xf32>
    %32 = arith.truncf %31 : vector<16x16x4xf32> to vector<16x16x4xbf16>
    %c1_35 = arith.constant 1 : index
    %c2_36 = arith.constant 2 : index
    %c0_37 = arith.constant 0 : index
    %33 = vector.load %arg8[%c1_35, %c2_36, %c0_37] : memref<18x18x4xf32, #tpu.memory_space<vmem>>, vector<16x16x4xf32>
    %34 = arith.truncf %33 : vector<16x16x4xf32> to vector<16x16x4xbf16>
    %35 = tpu.concatenate %30, %32, %34 in 2 : vector<16x16x4xbf16>, vector<16x16x4xbf16>, vector<16x16x4xbf16> -> vector<16x16x12xbf16>
    %36 = vector.shape_cast %35 : vector<16x16x12xbf16> to vector<256x12xbf16>
    %c1_38 = arith.constant 1 : index
    %c0_39 = arith.constant 0 : index
    %c0_40 = arith.constant 0 : index
    %37 = vector.load %arg5[%c1_38, %c0_39, %c0_40] : memref<3x12x4xbf16, #tpu.memory_space<vmem>>, vector<1x12x4xbf16>
    %38 = vector.shape_cast %37 : vector<1x12x4xbf16> to vector<12x4xbf16>
    %cst_41 = arith.constant dense<0.000000e+00> : vector<256x4xf32>
    %39 = tpu.matmul %36, %38, %cst_41 {dimension_numbers = #tpu.dot_dimension_numbers<[1], [0], [0], [1], [0, 0, 1, 1], [], []>} : vector<256x12xbf16>, vector<12x4xbf16>, vector<256x4xf32> -> vector<256x4xf32>
    %40 = arith.addf %28, %39 : vector<256x4xf32>
    %c2_42 = arith.constant 2 : index
    %c0_43 = arith.constant 0 : index
    %c0_44 = arith.constant 0 : index
    %41 = vector.load %arg8[%c2_42, %c0_43, %c0_44] : memref<18x18x4xf32, #tpu.memory_space<vmem>>, vector<16x16x4xf32>
    %42 = arith.truncf %41 : vector<16x16x4xf32> to vector<16x16x4xbf16>
    %c2_45 = arith.constant 2 : index
    %c1_46 = arith.constant 1 : index
    %c0_47 = arith.constant 0 : index
    %43 = vector.load %arg8[%c2_45, %c1_46, %c0_47] : memref<18x18x4xf32, #tpu.memory_space<vmem>>, vector<16x16x4xf32>
    %44 = arith.truncf %43 : vector<16x16x4xf32> to vector<16x16x4xbf16>
    %c2_48 = arith.constant 2 : index
    %c2_49 = arith.constant 2 : index
    %c0_50 = arith.constant 0 : index
    %45 = vector.load %arg8[%c2_48, %c2_49, %c0_50] : memref<18x18x4xf32, #tpu.memory_space<vmem>>, vector<16x16x4xf32>
    %46 = arith.truncf %45 : vector<16x16x4xf32> to vector<16x16x4xbf16>
    %47 = tpu.concatenate %42, %44, %46 in 2 : vector<16x16x4xbf16>, vector<16x16x4xbf16>, vector<16x16x4xbf16> -> vector<16x16x12xbf16>
    %48 = vector.shape_cast %47 : vector<16x16x12xbf16> to vector<256x12xbf16>
    %c2_51 = arith.constant 2 : index
    %c0_52 = arith.constant 0 : index
    %c0_53 = arith.constant 0 : index
    %49 = vector.load %arg5[%c2_51, %c0_52, %c0_53] : memref<3x12x4xbf16, #tpu.memory_space<vmem>>, vector<1x12x4xbf16>
    %50 = vector.shape_cast %49 : vector<1x12x4xbf16> to vector<12x4xbf16>
    %cst_54 = arith.constant dense<0.000000e+00> : vector<256x4xf32>
    %51 = tpu.matmul %48, %50, %cst_54 {dimension_numbers = #tpu.dot_dimension_numbers<[1], [0], [0], [1], [0, 0, 1, 1], [], []>} : vector<256x12xbf16>, vector<12x4xbf16>, vector<256x4xf32> -> vector<256x4xf32>
    %52 = arith.addf %40, %51 : vector<256x4xf32>
    %53 = vector.shape_cast %52 : vector<256x4xf32> to vector<16x16x4xf32>
    %c0_55 = arith.constant 0 : index
    %c0_56 = arith.constant 0 : index
    %c0_57 = arith.constant 0 : index
    %c0_58 = arith.constant 0 : index
    %54 = vector.load %arg7[%c0_55, %c0_56, %c0_57, %c0_58] : memref<1x16x16x4xf32, #tpu.memory_space<vmem>>, vector<1x16x16x4xf32>
    %55 = vector.shape_cast %54 : vector<1x16x16x4xf32> to vector<16x16x4xf32>
    %56 = vector.shape_cast %53 : vector<16x16x4xf32> to vector<1x16x16x4xf32>
    tpu.vector_store %arg7[%c0_55, %c0_56, %c0_57, %c0_58], %56 {strides = array<i32>} : memref<1x16x16x4xf32, #tpu.memory_space<vmem>>, vector<1x16x16x4xf32>,
    return
  }
  func.func @transform_0(%arg0: i32, %arg1: i32) -> (i32, i32, i32, i32) {
    %c0_i32 = arith.constant 0 : i32
    %c0_i32_0 = arith.constant 0 : i32
    %c0_i32_1 = arith.constant 0 : i32
    return %arg0, %arg1, %c0_i32, %c0_i32_0 : i32, i32, i32, i32
  }
  func.func @transform_1(%arg0: i32, %arg1: i32) -> (i32, i32, i32, i32) {
    %c16_i32 = arith.constant 16 : i32
    %0 = arith.muli %arg1, %c16_i32 : i32
    %c1_i32 = arith.constant 1 : i32
    %1 = arith.subi %0, %c1_i32 : i32
    %c0_i32 = arith.constant 0 : i32
    %2 = arith.maxsi %1, %c0_i32 : i32
    %c0_i32_0 = arith.constant 0 : i32
    %c0_i32_1 = arith.constant 0 : i32
    %c0_i32_2 = arith.constant 0 : i32
    return %arg0, %2, %c0_i32_0, %c0_i32_1 : i32, i32, i32, i32
  }
  func.func @transform_2(%arg0: i32, %arg1: i32) -> (i32, i32, i32, i32) {
    %c16_i32 = arith.constant 16 : i32
    %0 = arith.muli %arg1, %c16_i32 : i32
    %c16_i32_0 = arith.constant 16 : i32
    %1 = arith.addi %0, %c16_i32_0 : i32
    %c15_i32 = arith.constant 15 : i32
    %2 = arith.minsi %1, %c15_i32 : i32
    %c0_i32 = arith.constant 0 : i32
    %c0_i32_1 = arith.constant 0 : i32
    %c0_i32_2 = arith.constant 0 : i32
    return %arg0, %2, %c0_i32, %c0_i32_1 : i32, i32, i32, i32
  }
  func.func @transform_3(%arg0: i32, %arg1: i32) -> (i32, i32, i32) {
    %c0_i32 = arith.constant 0 : i32
    %c0_i32_0 = arith.constant 0 : i32
    %c0_i32_1 = arith.constant 0 : i32
    %c0_i32_2 = arith.constant 0 : i32
    return %c0_i32, %c0_i32_0, %c0_i32_1 : i32, i32, i32
  }
  func.func @transform_4(%arg0: i32, %arg1: i32) -> (i32, i32) {
    %c0_i32 = arith.constant 0 : i32
    %c0_i32_0 = arith.constant 0 : i32
    %c0_i32_1 = arith.constant 0 : i32
    return %c0_i32, %c0_i32_0 : i32, i32
  }
  func.func @transform_5(%arg0: i32, %arg1: i32) -> (i32, i32, i32, i32) {
    %c0_i32 = arith.constant 0 : i32
    %c0_i32_0 = arith.constant 0 : i32
    %c0_i32_1 = arith.constant 0 : i32
    return %arg0, %arg1, %c0_i32, %c0_i32_0 : i32, i32, i32, i32
  }
}

</mosaic_0001>

<bundles_post_ra>
// kernel: tpu_custom_call.1
= control target key start
LH: loop header
LB: loop body
LE: loop exit
PB: predicated region body
PF: predicated region fallthrough
CT: control target
= control target key end

     0   :  { %s2862_s18 = smov 0   ;;  %s2864_s19 = smov 0   ;;  %s3665_s0 = inlined_call_operand.vmem [shape: f32[2,16,16,4], index: 0, kind: input, shape index: {}]   ;;  %s3666_s1 = inlined_call_operand.vmem [shape: f32[2,16,16,4], index: 1, kind: input, shape index: {}]   ;;  %s3667_s2 = inlined_call_operand.vmem [shape: f32[2,16,16,4], index: 2, kind: input, shape index: {}]   ;;  %s3668_s3 = inlined_call_operand.vmem [shape: bf16[3,12,4], index: 3, kind: input, shape index: {}]   ;;  %s3669_s4 = inlined_call_operand.vmem [shape: f32[1,4], index: 4, kind: input, shape index: {}]   ;;  %s3670_s5 = inlined_call_operand.vmem [shape: f32[2,16,16,4], index: 5, kind: output, shape index: {}]  }
   0x1   :  { %s2866_s20 = smov 0  }
   0x2 LB: > { %s27_s1 = sadd.s32 1, %s2823_s19  ;;  %p2448_p0 = scmp.ge.s32.totalorder %s2827_s20, 1  ;;  %s2827_s20 = sphi %s2866_s20, %s15_s20   ;;  %s2823_s19 = sphi %s2864_s19, %s3672_s19   ;;  %s2819_s18 = sphi %s2862_s18, %s3671_s18  }
   0x3   : > { %p29_p1 = scmp.ge.s32.totalorder %s27_s1, 2  ;;  %p273_p2 = scmp.lt.s32.totalorder %s2827_s20, 3 }
   0x5   : > { %s3674_s1 = smov (%p29_p1, %s27_s1), 0  ;;  %p274_p3 = pnand %p2448_p0, %p273_p2 }
   0x6   : > { %vm394_vm0 = vcmask (!%p274_p3), 31744   ;;  %vm397_vm1 = vcmask (!%p274_p3), 25600   ;;  %v2829_v0 = vmov (!%p274_p3), 0.0   ;;  %p338_p4 = scmp.lt.s32.totalorder (!%p274_p3), %s2819_s18, 1  ;;  %v2802_v1 = vld [vmem:[%s3668_s3] sm:$0x3f] (!%p274_p3)  }
   0x7   : > { %277 = sbr.rel (%p274_p3) target bundleno = 564 (0x234), region = 40  ;;  %395 = vst.msk [vmem:[#allocation2] sm:$0xff] (!%p274_p3), %vm394_vm0, %v2829_v0  ;;  %396 = vst.msk [vmem:[#allocation2 + $0x8] sm:$0xff] (!%p274_p3), %vm394_vm0, %v2829_v0  ;;  %vm964_vm2 = vcmask (!%p274_p3), 1045504   ;;  %s2830_s26 = smov (!%p274_p3), 8   ;;  %vm891_vm3 = vcmask (!%p274_p3), 64512  }
   0x8   : > { %398 = vst.msk [vmem:[#allocation2 + $0x10] sm:$0x3] (!%p274_p3), %vm397_vm1, %v2829_v0  ;;  %401 = vst.msk [vmem:[#allocation2 + $0x28] sm:$0x3] (!%p274_p3), %vm397_vm1, %v2829_v0  ;;  %2771 = vmatprep.subr.msk.bf16.mxu1 (!%p274_p3), %vm964_vm2, %v2802_v1  ;;  %v966_v2 = vsel (!%p274_p3), %vm964_vm2, %v2802_v1, 0  ;;  %s2831_s27 = smov (!%p274_p3), 4  }
   0x9   : > { %399 = vst.msk [vmem:[#allocation2 + $0x18] sm:$0xff] (!%p274_p3), %vm394_vm0, %v2829_v0  ;;  %400 = vst.msk [vmem:[#allocation2 + $0x20] sm:$0xff] (!%p274_p3), %vm394_vm0, %v2829_v0  ;;  %2572 = vmatpush3.bf16.msra.mxu1 (!%p274_p3), %v966_v2  ;;  %v2803_v60 = vld [vmem:[%s3668_s3 + $0x8] sm:$0x3f] (!%p274_p3)   ;;  %vm931_vm4 = vcmask (!%p274_p3), 97280  }
   0xa   : > { %402 = vst.msk [vmem:[#allocation2 + $0x30] sm:$0xff] (!%p274_p3), %vm394_vm0, %v2829_v0  ;;  %403 = vst.msk [vmem:[#allocation2 + $0x38] sm:$0xff] (!%p274_p3), %vm394_vm0, %v2829_v0  ;;  %2772 = vmatprep.subr.msk.bf16.mxu0 (!%p274_p3), %vm964_vm2, %v2803_v60  ;;  %v3046_v63 = vsel (!%p274_p3), %vm964_vm2, %v2803_v60, 0  ;;  %2773 = vmatprep.subr.msk.bf16.mxu1 (!%p274_p3), %vm964_vm2, %v2803_v60 }
   0xb   : > { %404 = vst.msk [vmem:[#allocation2 + $0x40] sm:$0x3] (!%p274_p3), %vm397_vm1, %v2829_v0  ;;  %407 = vst.msk [vmem:[#allocation2 + $0x58] sm:$0x3] (!%p274_p3), %vm397_vm1, %v2829_v0  ;;  %2606 = vmatpush3.bf16.msra.mxu0 (!%p274_p3), %v3046_v63 }
   0xc   : > { %405 = vst.msk [vmem:[#allocation2 + $0x48] sm:$0xff] (!%p274_p3), %vm394_vm0, %v2829_v0  ;;  %406 = vst.msk [vmem:[#allocation2 + $0x50] sm:$0xff] (!%p274_p3), %vm394_vm0, %v2829_v0 }
   0xd   : > { %408 = vst.msk [vmem:[#allocation2 + $0x60] sm:$0xff] (!%p274_p3), %vm394_vm0, %v2829_v0  ;;  %409 = vst.msk [vmem:[#allocation2 + $0x68] sm:$0xff] (!%p274_p3), %vm394_vm0, %v2829_v0 }
   0xe   : > { %410 = vst.msk [vmem:[#allocation2 + $0x70] sm:$0x3] %vm397_vm1, %v2829_v0  ;;  %413 = vst.msk [vmem:[#allocation2 + $0x88] sm:$0x3] %vm397_vm1, %v2829_v0  ;;  %s3676_s18 = smov (!%p338_p4, %s2819_s18), 1  ;;  %v699_v6 = vld [vmem:[#allocation2 + $0x2] sm:$0xff] }
   0xf   : > { %411 = vst.msk [vmem:[#allocation2 + $0x78] sm:$0xff] %vm394_vm0, %v2829_v0  ;;  %412 = vst.msk [vmem:[#allocation2 + $0x80] sm:$0xff] %vm394_vm0, %v2829_v0  ;;  %s2515_s22 = sshll.u32 %s3676_s18, 8  ;;  %v700_v7 = vld [vmem:[#allocation2 + $0xa] sm:$0xff]  ;;  %v651_v8 = vld [vmem:[#allocation2 + $0x1] sm:$0xff] }
  0x10   : > { %414 = vst.msk [vmem:[#allocation2 + $0x90] sm:$0xff] %vm394_vm0, %v2829_v0  ;;  %415 = vst.msk [vmem:[#allocation2 + $0x98] sm:$0xff] %vm394_vm0, %v2829_v0  ;;  %s2951_s25 = scalar_lea.vmem %s3665_s0, %s2515_s22  ;;  %v731_v9 = vpack.c.bf16 %v700_v7, %v699_v6  ;;  %v652_v10 = vld [vmem:[#allocation2 + $0x9] sm:$0xff]  ;;  %s3526_s11 = scalar_lea.vmem %s3670_s5, %s2515_s22 }
  0x11   : > { %416 = vst.msk [vmem:[#allocation2 + $0xa0] sm:$0x3] %vm397_vm1, %v2829_v0  ;;  %419 = vst.msk [vmem:[#allocation2 + $0xb8] sm:$0x3] %vm397_vm1, %v2829_v0  ;;  %v450_v3 = vld [vmem:[%s2951_s25] sm:$0xff]  ;;  %v451_v4 = vld [vmem:[%s2951_s25 + $0x8] sm:$0xff]  ;;  %v683_v13 = vpack.c.bf16 %v652_v10, %v651_v8 }
  0x12   : > { %417 = vst.msk [vmem:[#allocation2 + $0xa8] sm:$0xff] %vm394_vm0, %v2829_v0  ;;  %418 = vst.msk [vmem:[#allocation2 + $0xb0] sm:$0xff] %vm394_vm0, %v2829_v0  ;;  %v452_v5 = vld [vmem:[%s2951_s25 + $0x10] sm:$0xff]  ;;  %v453_v11 = vld [vmem:[%s2951_s25 + $0x18] sm:$0xff]  ;;  %811 = vrot.lane.b32.xlu1 %v731_v9, %s2830_s26 }
  0x13   : > { %420 = vst.msk [vmem:[#allocation2 + $0xc0] sm:$0xff] %vm394_vm0, %v2829_v0  ;;  %421 = vst.msk [vmem:[#allocation2 + $0xc8] sm:$0xff] %vm394_vm0, %v2829_v0  ;;  %v454_v12 = vld [vmem:[%s2951_s25 + $0x20] sm:$0xff]  ;;  %v455_v14 = vld [vmem:[%s2951_s25 + $0x28] sm:$0xff]  ;;  %763 = vrot.lane.b32.xlu0 %v683_v13, %s2831_s27 }
  0x14   : > { %422 = vst.msk [vmem:[#allocation2 + $0xd0] sm:$0x3] %vm397_vm1, %v2829_v0  ;;  %425 = vst.msk [vmem:[#allocation2 + $0xe8] sm:$0x3] %vm397_vm1, %v2829_v0  ;;  %v456_v15 = vld [vmem:[%s2951_s25 + $0x30] sm:$0xff]  ;;  %v457_v16 = vld [vmem:[%s2951_s25 + $0x38] sm:$0xff] }
  0x15   : > { %423 = vst.msk [vmem:[#allocation2 + $0xd8] sm:$0xff] %vm394_vm0, %v2829_v0  ;;  %424 = vst.msk [vmem:[#allocation2 + $0xe0] sm:$0xff] %vm394_vm0, %v2829_v0  ;;  %v458_v17 = vld [vmem:[%s2951_s25 + $0x40] sm:$0xff]  ;;  %v459_v18 = vld [vmem:[%s2951_s25 + $0x48] sm:$0xff] }
  0x16   : > { %426 = vst.msk [vmem:[#allocation2 + $0xf0] sm:$0xff] %vm394_vm0, %v2829_v0  ;;  %427 = vst.msk [vmem:[#allocation2 + $0xf8] sm:$0xff] %vm394_vm0, %v2829_v0  ;;  %v460_v19 = vld [vmem:[%s2951_s25 + $0x50] sm:$0xff]  ;;  %v461_v20 = vld [vmem:[%s2951_s25 + $0x58] sm:$0xff] }
  0x17   : > { %428 = vst.msk [vmem:[#allocation2 + $0x100] sm:$0x3] %vm397_vm1, %v2829_v0  ;;  %431 = vst.msk [vmem:[#allocation2 + $0x118] sm:$0x3] %vm397_vm1, %v2829_v0  ;;  %v462_v21 = vld [vmem:[%s2951_s25 + $0x60] sm:$0xff]  ;;  %v463_v22 = vld [vmem:[%s2951_s25 + $0x68] sm:$0xff] }
  0x18   : > { %429 = vst.msk [vmem:[#allocation2 + $0x108] sm:$0xff] %vm394_vm0, %v2829_v0  ;;  %430 = vst.msk [vmem:[#allocation2 + $0x110] sm:$0xff] %vm394_vm0, %v2829_v0  ;;  %v464_v23 = vld [vmem:[%s2951_s25 + $0x70] sm:$0xff]  ;;  %v465_v24 = vld [vmem:[%s2951_s25 + $0x78] sm:$0xff] }
  0x19   : > { %432 = vst.msk [vmem:[#allocation2 + $0x120] sm:$0xff] %vm394_vm0, %v2829_v0  ;;  %433 = vst.msk [vmem:[#allocation2 + $0x128] sm:$0xff] %vm394_vm0, %v2829_v0  ;;  %v466_v25 = vld [vmem:[%s2951_s25 + $0x80] sm:$0xff]  ;;  %v467_v26 = vld [vmem:[%s2951_s25 + $0x88] sm:$0xff] }
  0x1a   : > { %434 = vst.msk [vmem:[#allocation2 + $0x130] sm:$0x3] %vm397_vm1, %v2829_v0  ;;  %437 = vst.msk [vmem:[#allocation2 + $0x148] sm:$0x3] %vm397_vm1, %v2829_v0  ;;  %v470_v27 = vld [vmem:[%s2951_s25 + $0xa0] sm:$0xff]  ;;  %v471_v28 = vld [vmem:[%s2951_s25 + $0xa8] sm:$0xff] }
  0x1b   : > { %435 = vst.msk [vmem:[#allocation2 + $0x138] sm:$0xff] %vm394_vm0, %v2829_v0  ;;  %436 = vst.msk [vmem:[#allocation2 + $0x140] sm:$0xff] %vm394_vm0, %v2829_v0  ;;  %v468_v35 = vld [vmem:[%s2951_s25 + $0x90] sm:$0xff]  ;;  %v469_v47 = vld [vmem:[%s2951_s25 + $0x98] sm:$0xff] }
  0x1c   : > { %438 = vst.msk [vmem:[#allocation2 + $0x150] sm:$0xff] %vm394_vm0, %v2829_v0  ;;  %439 = vst.msk [vmem:[#allocation2 + $0x158] sm:$0xff] %vm394_vm0, %v2829_v0  ;;  %v474_v50 = vld [vmem:[%s2951_s25 + $0xc0] sm:$0xff]  ;;  %v475_v51 = vld [vmem:[%s2951_s25 + $0xc8] sm:$0xff] }
  0x1d   : > { %440 = vst.msk [vmem:[#allocation2 + $0x160] sm:$0x3] %vm397_vm1, %v2829_v0  ;;  %443 = vst.msk [vmem:[#allocation2 + $0x178] sm:$0x3] %vm397_vm1, %v2829_v0  ;;  %v472_v53 = vld [vmem:[%s2951_s25 + $0xb0] sm:$0xff]  ;;  %v473_v54 = vld [vmem:[%s2951_s25 + $0xb8] sm:$0xff] }
  0x1e   : > { %441 = vst.msk [vmem:[#allocation2 + $0x168] sm:$0xff] %vm394_vm0, %v2829_v0  ;;  %442 = vst.msk [vmem:[#allocation2 + $0x170] sm:$0xff] %vm394_vm0, %v2829_v0  ;;  %v478_v55 = vld [vmem:[%s2951_s25 + $0xe0] sm:$0xff]  ;;  %v479_v56 = vld [vmem:[%s2951_s25 + $0xe8] sm:$0xff] }
  0x1f   : > { %444 = vst.msk [vmem:[#allocation2 + $0x180] sm:$0xff] %vm394_vm0, %v2829_v0  ;;  %445 = vst.msk [vmem:[#allocation2 + $0x188] sm:$0xff] %vm394_vm0, %v2829_v0  ;;  %v476_v57 = vld [vmem:[%s2951_s25 + $0xd0] sm:$0xff]  ;;  %v477_v58 = vld [vmem:[%s2951_s25 + $0xd8] sm:$0xff] }
  0x20   : > { %446 = vst.msk [vmem:[#allocation2 + $0x190] sm:$0x3] %vm397_vm1, %v2829_v0  ;;  %449 = vst.msk [vmem:[#allocation2 + $0x1a8] sm:$0x3] %vm397_vm1, %v2829_v0  ;;  %v3078_v13 = vld [vmem:[%s2951_s25 + $0xf8] sm:$0xff]  ;;  %v604_v60 = vld [vmem:[#allocation2 + $0x8] sm:$0xff] }
  0x21   : > { %447 = vst.msk [vmem:[#allocation2 + $0x198] sm:$0xff] %vm394_vm0, %v2829_v0  ;;  %448 = vst.msk [vmem:[#allocation2 + $0x1a0] sm:$0xff] %vm394_vm0, %v2829_v0 }
  0x22   : > { %483 = vst.msk [vmem:[#allocation2 + $0x19] sm:$0xff] %vm394_vm0, %v450_v3  ;;  %484 = vst.msk [vmem:[#allocation2 + $0x21] sm:$0xff] %vm394_vm0, %v451_v4 }
  0x23   : > { %485 = vst.msk [vmem:[#allocation2 + $0x31] sm:$0xff] %vm394_vm0, %v452_v5  ;;  %486 = vst.msk [vmem:[#allocation2 + $0x39] sm:$0xff] %vm394_vm0, %v453_v11 }
  0x24   : > { %487 = vst.msk [vmem:[#allocation2 + $0x49] sm:$0xff] %vm394_vm0, %v454_v12  ;;  %488 = vst.msk [vmem:[#allocation2 + $0x51] sm:$0xff] %vm394_vm0, %v455_v14  ;;  %v3075_v12 = vld [vmem:[%s2951_s25 + $0xf0] sm:$0xff] }
  0x25   : > { %489 = vst.msk [vmem:[#allocation2 + $0x61] sm:$0xff] %vm394_vm0, %v456_v15  ;;  %490 = vst.msk [vmem:[#allocation2 + $0x69] sm:$0xff] %vm394_vm0, %v457_v16 }
  0x26   : > { %491 = vst.msk [vmem:[#allocation2 + $0x79] sm:$0xff] %vm394_vm0, %v458_v17  ;;  %492 = vst.msk [vmem:[#allocation2 + $0x81] sm:$0xff] %vm394_vm0, %v459_v18 }
  0x27   : > { %493 = vst.msk [vmem:[#allocation2 + $0x91] sm:$0xff] %vm394_vm0, %v460_v19  ;;  %494 = vst.msk [vmem:[#allocation2 + $0x99] sm:$0xff] %vm394_vm0, %v461_v20 }
  0x28   : > { %495 = vst.msk [vmem:[#allocation2 + $0xa9] sm:$0xff] %vm394_vm0, %v462_v21  ;;  %496 = vst.msk [vmem:[#allocation2 + $0xb1] sm:$0xff] %vm394_vm0, %v463_v22 }
  0x29   : > { %497 = vst.msk [vmem:[#allocation2 + $0xc1] sm:$0xff] %vm394_vm0, %v464_v23  ;;  %498 = vst.msk [vmem:[#allocation2 + $0xc9] sm:$0xff] %vm394_vm0, %v465_v24  ;;  %v701_v29 = vld [vmem:[#allocation2 + $0x1a] sm:$0xff]  ;;  %v702_v30 = vld [vmem:[#allocation2 + $0x22] sm:$0xff] }
  0x2a   : > { %499 = vst.msk [vmem:[#allocation2 + $0xd9] sm:$0xff] %vm394_vm0, %v466_v25  ;;  %v653_v31 = vld [vmem:[#allocation2 + $0x19] sm:$0xff]  ;;  %500 = vst.msk [vmem:[#allocation2 + $0xe1] sm:$0xff] %vm394_vm0, %v467_v26  ;;  %v732_v32 = vpack.c.bf16 %v702_v30, %v701_v29  ;;  %v654_v33 = vld [vmem:[#allocation2 + $0x21] sm:$0xff] }
  0x2b   : > { %503 = vst.msk [vmem:[#allocation2 + $0x109] sm:$0xff] %vm394_vm0, %v470_v27  ;;  %504 = vst.msk [vmem:[#allocation2 + $0x111] sm:$0xff] %vm394_vm0, %v471_v28  ;;  %v1211_v34 = vld [vmem:[#allocation2 + $0x31] sm:$0xff]  ;;  %v684_v36 = vpack.c.bf16 %v654_v33, %v653_v31  ;;  %v1212_v37 = vld [vmem:[#allocation2 + $0x39] sm:$0xff] }
  0x2c   : > { %501 = vst.msk [vmem:[#allocation2 + $0xf1] sm:$0xff] %vm394_vm0, %v468_v35  ;;  %813 = vrot.lane.b32.xlu1 %v732_v32, %s2830_s26  ;;  %v2998_v38 = vpack.c.bf16 %v1212_v37, %v1211_v34  ;;  %v1259_v39 = vld [vmem:[#allocation2 + $0x32] sm:$0xff]  ;;  %v1260_v40 = vld [vmem:[#allocation2 + $0x3a] sm:$0xff]  ;;  %v657_v42 = vld [vmem:[#allocation2 + $0x49] sm:$0xff] }
  0x2d   : > { %765 = vrot.lane.b32.xlu0 %v684_v36, %s2831_s27  ;;  %v3003_v41 = vpack.c.bf16 %v1260_v40, %v1259_v39  ;;  %v658_v43 = vld [vmem:[#allocation2 + $0x51] sm:$0xff]  ;;  %v1215_v48 = vld [vmem:[#allocation2 + $0x61] sm:$0xff]  ;;  %v1216_v49 = vld [vmem:[#allocation2 + $0x69] sm:$0xff]  ;;  %502 = vst.msk [vmem:[#allocation2 + $0xf9] sm:$0xff] %vm394_vm0, %v469_v47 }
  0x2e   : > { %v3008_v44 = vpack.c.bf16 %v658_v43, %v657_v42  ;;  %v705_v45 = vld [vmem:[#allocation2 + $0x4a] sm:$0xff]  ;;  %v706_v46 = vld [vmem:[#allocation2 + $0x52] sm:$0xff]  ;;  %507 = vst.msk [vmem:[#allocation2 + $0x139] sm:$0xff] %vm394_vm0, %v474_v50  ;;  %508 = vst.msk [vmem:[#allocation2 + $0x141] sm:$0xff] %vm394_vm0, %v475_v51  ;;  %v3037_v59 = vpack.c.bf16 %v1216_v49, %v1215_v48 }
  0x2f   : > { %v3017_v52 = vpack.c.bf16 %v706_v46, %v705_v45  ;;  %505 = vst.msk [vmem:[#allocation2 + $0x121] sm:$0xff] %vm394_vm0, %v472_v53  ;;  %506 = vst.msk [vmem:[#allocation2 + $0x129] sm:$0xff] %vm394_vm0, %v473_v54  ;;  %v1263_v61 = vld [vmem:[#allocation2 + $0x62] sm:$0xff]  ;;  %v1264_v62 = vld [vmem:[#allocation2 + $0x6a] sm:$0xff] }
  0x30   : > { %1323 = vrot.lane.b32.xlu1 %v2998_v38, %s2831_s27  ;;  %511 = vst.msk [vmem:[#allocation2 + $0x169] sm:$0xff] %vm394_vm0, %v478_v55  ;;  %512 = vst.msk [vmem:[#allocation2 + $0x171] sm:$0xff] %vm394_vm0, %v479_v56  ;;  %v3052_v0 = vpack.c.bf16 %v1264_v62, %v1263_v61  ;;  %v661_v1 = vld [vmem:[#allocation2 + $0x79] sm:$0xff]  ;;  %v662_v2 = vld [vmem:[#allocation2 + $0x81] sm:$0xff] }
  0x31   : > { %1321 = vrot.lane.b32.xlu0 %v684_v36, %s2831_s27  ;;  %509 = vst.msk [vmem:[#allocation2 + $0x151] sm:$0xff] %vm394_vm0, %v476_v57  ;;  %510 = vst.msk [vmem:[#allocation2 + $0x159] sm:$0xff] %vm394_vm0, %v477_v58  ;;  %v3058_v3 = vpack.c.bf16 %v662_v2, %v661_v1  ;;  %v709_v4 = vld [vmem:[#allocation2 + $0x7a] sm:$0xff]  ;;  %v710_v5 = vld [vmem:[#allocation2 + $0x82] sm:$0xff] }
  0x32   : > { %v3064_v6 = vpack.c.bf16 %v710_v5, %v709_v4  ;;  %v1219_v7 = vld [vmem:[#allocation2 + $0x91] sm:$0xff]  ;;  %v1220_v8 = vld [vmem:[#allocation2 + $0x99] sm:$0xff]  ;;  %513 = vst.msk [vmem:[#allocation2 + $0x181] sm:$0xff] %vm394_vm0, %v3075_v12  ;;  %514 = vst.msk [vmem:[#allocation2 + $0x189] sm:$0xff] %vm394_vm0, %v3078_v13 }
  0x33   : > { %v3070_v9 = vpack.c.bf16 %v1220_v8, %v1219_v7  ;;  %v1267_v10 = vld [vmem:[#allocation2 + $0x92] sm:$0xff]  ;;  %v1268_v11 = vld [vmem:[#allocation2 + $0x9a] sm:$0xff]  ;;  %v665_v15 = vld [vmem:[#allocation2 + $0xa9] sm:$0xff] }
  0x34   : > { %1371 = vrot.lane.b32.xlu1 %v3003_v41, %s2830_s26  ;;  %v3086_v14 = vpack.c.bf16 %v1268_v11, %v1267_v10  ;;  %v666_v16 = vld [vmem:[#allocation2 + $0xb1] sm:$0xff]  ;;  %v1223_v21 = vld [vmem:[#allocation2 + $0xc1] sm:$0xff]  ;;  %v1224_v22 = vld [vmem:[#allocation2 + $0xc9] sm:$0xff] }
  0x35   : > { %1369 = vrot.lane.b32.xlu0 %v732_v32, %s2830_s26  ;;  %v3092_v17 = vpack.c.bf16 %v666_v16, %v665_v15  ;;  %v713_v18 = vld [vmem:[#allocation2 + $0xaa] sm:$0xff]  ;;  %v714_v19 = vld [vmem:[#allocation2 + $0xb2] sm:$0xff]  ;;  %v3104_v23 = vpack.c.bf16 %v1224_v22, %v1223_v21  ;;  %v1271_v24 = vld [vmem:[#allocation2 + $0xc2] sm:$0xff] }
  0x36   : > { %v3098_v20 = vpack.c.bf16 %v714_v19, %v713_v18  ;;  %v1272_v25 = vld [vmem:[#allocation2 + $0xca] sm:$0xff]  ;;  %v669_v27 = vld [vmem:[#allocation2 + $0xd9] sm:$0xff]  ;;  %v670_v28 = vld [vmem:[#allocation2 + $0xe1] sm:$0xff] }
  0x37   : > { %v3110_v26 = vpack.c.bf16 %v1272_v25, %v1271_v24  ;;  %v3116_v29 = vpack.c.bf16 %v670_v28, %v669_v27  ;;  %v3121_v30 = vld [vmem:[%s3668_s3 + $0x10] sm:$0x3f]   ;;  %v717_v31 = vld [vmem:[#allocation2 + $0xda] sm:$0xff]  ;;  %v718_v32 = vld [vmem:[#allocation2 + $0xe2] sm:$0xff] }
  0x38   : > { %769 = vrot.lane.b32.xlu1 %v3008_v44, %s2831_s27  ;;  %2774 = vmatprep.subr.msk.bf16.mxu0 %vm964_vm2, %v3121_v30  ;;  %v3129_v33 = vpack.c.bf16 %v718_v32, %v717_v31  ;;  %v673_v34 = vld [vmem:[#allocation2 + $0x109] sm:$0xff]  ;;  %v674_v35 = vld [vmem:[#allocation2 + $0x111] sm:$0xff]  ;;  %v672_v37 = vld [vmem:[#allocation2 + $0xf9] sm:$0xff] }
  0x39   : > { %767 = vrot.lane.b32.xlu0 %v2998_v38, %s2831_s27  ;;  %v671_v36 = vld [vmem:[#allocation2 + $0xf1] sm:$0xff]  ;;  %v3143_v39 = vpack.c.bf16 %v674_v35, %v673_v34  ;;  %v720_v45 = vld [vmem:[#allocation2 + $0xfa] sm:$0xff]  ;;  %v676_v49 = vld [vmem:[#allocation2 + $0x129] sm:$0xff] }
  0x3a   : > { %v3147_v40 = vpack.c.bf16 %v672_v37, %v671_v36  ;;  %v721_v42 = vld [vmem:[#allocation2 + $0x10a] sm:$0xff]  ;;  %v722_v43 = vld [vmem:[#allocation2 + $0x112] sm:$0xff]  ;;  %v678_v47 = vld [vmem:[#allocation2 + $0x141] sm:$0xff] }
  0x3b   : > { %v675_v48 = vld [vmem:[#allocation2 + $0x121] sm:$0xff]  ;;  %v724_v55 = vld [vmem:[#allocation2 + $0x12a] sm:$0xff]  ;;  %v680_v62 = vld [vmem:[#allocation2 + $0x159] sm:$0xff] }
  0x3c   : > { %817 = vrot.lane.b32.xlu1 %v3017_v52, %s2830_s26  ;;  %v3171_v51 = vpack.c.bf16 %v676_v49, %v675_v48  ;;  %v726_v53 = vld [vmem:[#allocation2 + $0x142] sm:$0xff]  ;;  %v679_v61 = vld [vmem:[#allocation2 + $0x151] sm:$0xff]  ;;  %v728_v7 = vld [vmem:[#allocation2 + $0x15a] sm:$0xff] }
  0x3d   : > { %815 = vrot.lane.b32.xlu0 %v3003_v41, %s2830_s26  ;;  %v723_v54 = vld [vmem:[#allocation2 + $0x122] sm:$0xff]  ;;  %v3195_v2 = vpack.c.bf16 %v680_v62, %v679_v61  ;;  %v729_v4 = vld [vmem:[#allocation2 + $0x16a] sm:$0xff]  ;;  %v730_v5 = vld [vmem:[#allocation2 + $0x172] sm:$0xff] }
  0x3e   : > { %v3179_v57 = vpack.c.bf16 %v724_v55, %v723_v54  ;;  %v681_v58 = vld [vmem:[#allocation2 + $0x169] sm:$0xff]  ;;  %v3199_v10 = vpack.c.bf16 %v730_v5, %v729_v4  ;;  %v605_v15 = vld [vmem:[#allocation2 + $0x18] sm:$0xff]  ;;  %v606_v16 = vld [vmem:[#allocation2 + $0x20] sm:$0xff] }
  0x3f   : > { %v636_v18 = vpack.c.bf16 %v606_v16, %v605_v15  ;;  %v1163_v21 = vld [vmem:[#allocation2 + $0x30] sm:$0xff]  ;;  %v1164_v22 = vld [vmem:[#allocation2 + $0x38] sm:$0xff]  ;;  %v609_v37 = vld [vmem:[#allocation2 + $0x48] sm:$0xff] }
  0x40   : > { %1327 = vrot.lane.b32.xlu1 %v3037_v59, %s2831_s27  ;;  %v3219_v27 = vpack.c.bf16 %v1164_v22, %v1163_v21  ;;  %v1167_v49 = vld [vmem:[#allocation2 + $0x60] sm:$0xff]  ;;  %v613_v62 = vld [vmem:[#allocation2 + $0x78] sm:$0xff] }
  0x41   : > { %1325 = vrot.lane.b32.xlu0 %v3008_v44, %s2831_s27  ;;  %v1172_v15 = vld [vmem:[#allocation2 + $0x98] sm:$0xff] }
  0x44   : > { %1375 = vrot.lane.b32.xlu1 %v3052_v0, %s2830_s26 }
  0x45   : > { %1373 = vrot.lane.b32.xlu0 %v3017_v52, %s2830_s26 }
  0x48   : > { %773 = vrot.lane.b32.xlu1 %v3058_v3, %s2831_s27 }
  0x49   : > { %771 = vrot.lane.b32.xlu0 %v3037_v59, %s2831_s27 }
  0x4c   : > { %821 = vrot.lane.b32.xlu1 %v3064_v6, %s2830_s26 }
  0x4d   : > { %819 = vrot.lane.b32.xlu0 %v3052_v0, %s2830_s26 }
  0x50   : > { %1331 = vrot.lane.b32.xlu1 %v3070_v9, %s2831_s27 }
  0x51   : > { %1329 = vrot.lane.b32.xlu0 %v3058_v3, %s2831_s27 }
  0x54   : > { %1379 = vrot.lane.b32.xlu1 %v3086_v14, %s2830_s26 }
  0x55   : > { %1377 = vrot.lane.b32.xlu0 %v3064_v6, %s2830_s26 }
  0x58   : > { %777 = vrot.lane.b32.xlu1 %v3092_v17, %s2831_s27 }
  0x59   : > { %775 = vrot.lane.b32.xlu0 %v3070_v9, %s2831_s27 }
  0x5c   : > { %825 = vrot.lane.b32.xlu1 %v3098_v20, %s2830_s26 }
  0x5d   : > { %823 = vrot.lane.b32.xlu0 %v3086_v14, %s2830_s26 }
  0x60   : > { %1335 = vrot.lane.b32.xlu1 %v3104_v23, %s2831_s27 }
  0x61   : > { %1333 = vrot.lane.b32.xlu0 %v3092_v17, %s2831_s27 }
  0x64   : > { %1383 = vrot.lane.b32.xlu1 %v3110_v26, %s2830_s26 }
  0x65   : > { %1381 = vrot.lane.b32.xlu0 %v3098_v20, %s2830_s26 }
  0x68   : > { %781 = vrot.lane.b32.xlu1 %v3116_v29, %s2831_s27 }
  0x69   : > { %779 = vrot.lane.b32.xlu0 %v3104_v23, %s2831_s27 }
  0x6c   : > { %829 = vrot.lane.b32.xlu1 %v3129_v33, %s2830_s26 }
  0x6d   : > { %827 = vrot.lane.b32.xlu0 %v3110_v26, %s2830_s26 }
  0x70   : > { %1880 = vrot.lane.b32.xlu1 %v3008_v44, %s2831_s27  ;;  %v719_v44 = vld [vmem:[#allocation2 + $0xf2] sm:$0xff] }
  0x71   : > { %1878 = vrot.lane.b32.xlu0 %v2998_v38, %s2831_s27  ;;  %v3151_v38 = vpack.c.bf16 %v722_v43, %v721_v42  ;;  %v3155_v46 = vpack.c.bf16 %v720_v45, %v719_v44  ;;  %v610_v42 = vld [vmem:[#allocation2 + $0x50] sm:$0xff]  ;;  %v2079_v43 = vsel %vm964_vm2, %v3121_v30, 0 }
  0x74   : > { %1928 = vrot.lane.b32.xlu1 %v3017_v52, %s2830_s26  ;;  %v725_v52 = vld [vmem:[#allocation2 + $0x13a] sm:$0xff] }
  0x75   : > { %1926 = vrot.lane.b32.xlu0 %v3003_v41, %s2830_s26  ;;  %v677_v41 = vld [vmem:[#allocation2 + $0x139] sm:$0xff]  ;;  %v3175_v56 = vpack.c.bf16 %v726_v53, %v725_v52  ;;  %v1168_v52 = vld [vmem:[#allocation2 + $0x68] sm:$0xff] }
  0x76   : > { %v3167_v50 = vpack.c.bf16 %v678_v47, %v677_v41 }
  0x78   : > { %785 = vrot.lane.b32.xlu1 %v3143_v39, %s2831_s27 }
  0x79   : > { %783 = vrot.lane.b32.xlu0 %v3147_v40, %s2831_s27 }
  0x7c   : > { %833 = vrot.lane.b32.xlu1 %v3151_v38, %s2830_s26 }
  0x7d   : > { %831 = vrot.lane.b32.xlu0 %v3155_v46, %s2830_s26 }
  0x80   : > { %1884 = vrot.lane.b32.xlu1 %v3058_v3, %s2831_s27 }
  0x81   : > { %1882 = vrot.lane.b32.xlu0 %v3037_v59, %s2831_s27  ;;  %v682_v59 = vld [vmem:[#allocation2 + $0x171] sm:$0xff] }
  0x82   : > { %v3191_v1 = vpack.c.bf16 %v682_v59, %v681_v58 }
  0x84   : > { %1932 = vrot.lane.b32.xlu1 %v3064_v6, %s2830_s26  ;;  %v727_v6 = vld [vmem:[#allocation2 + $0x152] sm:$0xff]  ;;  %v812_v8 = vpop.permute.xlu1 %811 }
  0x85   : > { %1930 = vrot.lane.b32.xlu0 %v3052_v0, %s2830_s26  ;;  %v603_v0 = vld [vmem:[#allocation2] sm:$0xff] }
  0x86   : > { %v635_v3 = vpack.c.bf16 %v604_v60, %v603_v0  ;;  %v614_v0 = vld [vmem:[#allocation2 + $0x80] sm:$0xff] }
  0x88   : > { %789 = vrot.lane.b32.xlu1 %v3167_v50, %s2831_s27 }
  0x89   : > { %787 = vrot.lane.b32.xlu0 %v3171_v51, %s2831_s27 }
  0x8c   : > { %837 = vrot.lane.b32.xlu1 %v3175_v56, %s2830_s26 }
  0x8d   : > { %835 = vrot.lane.b32.xlu0 %v3179_v57, %s2830_s26 }
  0x90   : > { %1888 = vrot.lane.b32.xlu1 %v3092_v17, %s2831_s27 }
  0x91   : > { %1886 = vrot.lane.b32.xlu0 %v3070_v9, %s2831_s27  ;;  %v764_v9 = vpop.permute.xlu0 %763 }
  0x92   : > { %v845_v11 = vsel %vm394_vm0, %v635_v3, %v764_v9 }
  0x93   : > { %v893_v17 = vsel %vm891_vm3, %v845_v11, %v812_v8  ;;  %v1171_v11 = vld [vmem:[#allocation2 + $0x90] sm:$0xff] }
  0x94   : > { %1936 = vrot.lane.b32.xlu1 %v3098_v20, %s2830_s26  ;;  %2573 = vmatprep.mubr.msk.bf16.mxu1 %vm931_vm4, %v893_v17 }
  0x95   : > { %1934 = vrot.lane.b32.xlu0 %v3086_v14, %s2830_s26  ;;  %v3204_v14 = vpack.c.bf16 %v728_v7, %v727_v6 }
  0x98   : > { %793 = vrot.lane.b32.xlu1 %v3191_v1, %s2831_s27 }
  0x99   : > { %791 = vrot.lane.b32.xlu0 %v3195_v2, %s2831_s27 }
  0x9c   : > { %841 = vrot.lane.b32.xlu1 %v3199_v10, %s2830_s26 }
  0x9d   : > { %839 = vrot.lane.b32.xlu0 %v3204_v14, %s2830_s26 }
  0x9e   : > { %v814_v19 = vpop.permute.xlu1 %813 }
  0x9f   : > { %v766_v20 = vpop.permute.xlu0 %765 }
  0xa0   : > { %v848_v24 = vsel %vm394_vm0, %v636_v18, %v766_v20  ;;  %1892 = vrot.lane.b32.xlu1 %v3116_v29, %s2831_s27 }
  0xa1   : > { %1890 = vrot.lane.b32.xlu0 %v3104_v23, %s2831_s27  ;;  %v895_v25 = vsel %vm891_vm3, %v848_v24, %v814_v19  ;;  %v617_v24 = vld [vmem:[#allocation2 + $0xa8] sm:$0xff] }
  0xa2   : > { %2574 = vmatmul.mubr.msk.bf16.vlgmr.msra.gmra.mrb[0].mxu1 %vm931_vm4, %v895_v25  ;;  %v1324_v28 = vpop.permute.xlu1 %1323  ;;  %v618_v25 = vld [vmem:[#allocation2 + $0xb0] sm:$0xff] }
  0xa3   : > { %v1322_v31 = vpop.permute.xlu0 %1321  ;;  %2674 = vmatpush3.bf16.msra.mxu1 %v3046_v63  ;;  %v1406_v32 = vsel %vm394_vm0, %v3219_v27, %v1324_v28 }
  0xa4   : > { %1940 = vrot.lane.b32.xlu1 %v3129_v33, %s2830_s26  ;;  %v1403_v34 = vsel %vm394_vm0, %v636_v18, %v1322_v31 }
  0xa5   : > { %1938 = vrot.lane.b32.xlu0 %v3110_v26, %s2830_s26  ;;  %v3239_v26 = vpack.c.bf16 %v610_v42, %v609_v37  ;;  %v1175_v37 = vld [vmem:[#allocation2 + $0xc0] sm:$0xff]  ;;  %v1176_v42 = vld [vmem:[#allocation2 + $0xc8] sm:$0xff] }
  0xa6   : > { %v1372_v23 = vpop.permute.xlu1 %1371 }
  0xa7   : > { %v1452_v35 = vsel %vm891_vm3, %v1406_v32, %v1372_v23  ;;  %v1370_v36 = vpop.permute.xlu0 %1369 }
  0xa8   : > { %1339 = vrot.lane.b32.xlu1 %v3147_v40, %s2831_s27  ;;  %v1450_v63 = vsel %vm891_vm3, %v1403_v34, %v1370_v36 }
  0xa9   : > { %1337 = vrot.lane.b32.xlu0 %v3116_v29, %s2831_s27  ;;  %2607 = vmatprep.mubr.msk.bf16.mxu0 %vm931_vm4, %v1450_v63 }
  0xaa   : > { %2608 = vmatmul.mubr.msk.bf16.vlgmr.msra.gmra.mrb[0].mxu0 %vm931_vm4, %v1452_v35  ;;  %v770_v44 = vpop.permute.xlu1 %769 }
  0xab   : > { %v768_v45 = vpop.permute.xlu0 %767  ;;  %2640 = vmatpush3.bf16.msra.mxu0 %v2079_v43  ;;  %v854_v30 = vsel %vm394_vm0, %v3239_v26, %v770_v44  ;;  %v1240_v43 = vld [vmem:[#allocation2 + $0x189] sm:$0xff]  ;;  %v3329_v44 = vpack.c.bf16 %v1176_v42, %v1175_v37 }
  0xac   : > { %1387 = vrot.lane.b32.xlu1 %v3155_v46, %s2830_s26  ;;  %v851_v29 = vsel %vm394_vm0, %v3219_v27, %v768_v45 }
  0xad   : > { %1385 = vrot.lane.b32.xlu0 %v3129_v33, %s2830_s26  ;;  %v3257_v33 = vpack.c.bf16 %v1168_v52, %v1167_v49 }
  0xae   : > { %v818_v41 = vpop.permute.xlu1 %817 }
  0xaf   : > { %v899_v47 = vsel %vm891_vm3, %v854_v30, %v818_v41  ;;  %v816_v48 = vpop.permute.xlu0 %815 }
  0xb0   : > { %v897_v53 = vsel %vm891_vm3, %v851_v29, %v816_v48  ;;  %1896 = vrot.lane.b32.xlu1 %v3143_v39, %s2831_s27  ;;  %v1287_v29 = vld [vmem:[#allocation2 + $0x182] sm:$0xff] }
  0xb1   : > { %1894 = vrot.lane.b32.xlu0 %v3147_v40, %s2831_s27  ;;  %2577 = vmatprep.mubr.msk.bf16.mxu1 %vm931_vm4, %v897_v53 }
  0xb2   : > { %2578 = vmatmul.mubr.msk.bf16.gmra.mrb[4].mxu1 %vm931_vm4, %v899_v47  ;;  %v1328_v54 = vpop.permute.xlu1 %1327  ;;  %v1288_v47 = vld [vmem:[#allocation2 + $0x18a] sm:$0xff] }
  0xb3   : > { %v1326_v55 = vpop.permute.xlu0 %1325  ;;  %v1412_v58 = vsel %vm394_vm0, %v3257_v33, %v1328_v54  ;;  %v621_v54 = vld [vmem:[#allocation2 + $0xd8] sm:$0xff] }
  0xb4   : > { %1944 = vrot.lane.b32.xlu1 %v3151_v38, %s2830_s26  ;;  %v1409_v40 = vsel %vm394_vm0, %v3239_v26, %v1326_v55  ;;  %v622_v55 = vld [vmem:[#allocation2 + $0xe0] sm:$0xff] }
  0xb5   : > { %1942 = vrot.lane.b32.xlu0 %v3155_v46, %s2830_s26  ;;  %v3275_v46 = vpack.c.bf16 %v614_v0, %v613_v62 }
  0xb6   : > { %v1376_v59 = vpop.permute.xlu1 %1375 }
  0xb7   : > { %v1456_v60 = vsel %vm891_vm3, %v1412_v58, %v1376_v59  ;;  %v1374_v61 = vpop.permute.xlu0 %1373  ;;  %v1304_v59 = vpack.c.bf16 %v1288_v47, %v1287_v29  ;;  %v627_v47 = vld [vmem:[#allocation2 + $0x120] sm:$0xff] }
  0xb8   : > { %v1454_v3 = vsel %vm891_vm3, %v1409_v40, %v1374_v61  ;;  %1343 = vrot.lane.b32.xlu1 %v3171_v51, %s2831_s27  ;;  %v1797_v40 = vld [vmem:[#allocation2 + $0x1a1] sm:$0xff] }
  0xb9   : > { %1341 = vrot.lane.b32.xlu0 %v3143_v39, %s2831_s27  ;;  %2611 = vmatprep.mubr.msk.bf16.mxu0 %vm931_vm4, %v1454_v3  ;;  %v1844_v3 = vld [vmem:[#allocation2 + $0x19a] sm:$0xff] }
  0xba   : > { %2612 = vmatmul.mubr.msk.bf16.gmra.mrb[4].mxu0 %vm931_vm4, %v1456_v60  ;;  %v774_v4 = vpop.permute.xlu1 %773  ;;  %v3346_v60 = vpack.c.bf16 %v622_v55, %v621_v54 }
  0xbb   : > { %v772_v5 = vpop.permute.xlu0 %771  ;;  %v860_v6 = vsel %vm394_vm0, %v3275_v46, %v774_v4  ;;  %v1845_v4 = vld [vmem:[#allocation2 + $0x1a2] sm:$0xff] }
  0xbc   : > { %1391 = vrot.lane.b32.xlu1 %v3179_v57, %s2830_s26  ;;  %v857_v39 = vsel %vm394_vm0, %v3257_v33, %v772_v5 }
  0xbd   : > { %1389 = vrot.lane.b32.xlu0 %v3151_v38, %s2830_s26  ;;  %v3293_v38 = vpack.c.bf16 %v1172_v15, %v1171_v11 }
  0xbe   : > { %v822_v7 = vpop.permute.xlu1 %821 }
  0xbf   : > { %v903_v8 = vsel %vm891_vm3, %v860_v6, %v822_v7  ;;  %v820_v9 = vpop.permute.xlu0 %819 }
  0xc0   : > { %v901_v16 = vsel %vm891_vm3, %v857_v39, %v820_v9  ;;  %1900 = vrot.lane.b32.xlu1 %v3167_v50, %s2831_s27  ;;  %v1861_v9 = vpack.c.bf16 %v1845_v4, %v1844_v3 }
  0xc1   : > { %1898 = vrot.lane.b32.xlu0 %v3171_v51, %s2831_s27  ;;  %2581 = vmatprep.mubr.msk.bf16.mxu1 %vm931_vm4, %v901_v16 }
  0xc2   : > { %2582 = vmatmul.mubr.msk.bf16.gmra.mrb[8].mxu1 %vm931_vm4, %v903_v8  ;;  %v1332_v17 = vpop.permute.xlu1 %1331 }
  0xc3   : > { %v1330_v18 = vpop.permute.xlu0 %1329  ;;  %v1418_v19 = vsel %vm394_vm0, %v3293_v38, %v1332_v17 }
  0xc4   : > { %1948 = vrot.lane.b32.xlu1 %v3175_v56, %s2830_s26  ;;  %v1415_v51 = vsel %vm394_vm0, %v3275_v46, %v1330_v18 }
  0xc5   : > { %1946 = vrot.lane.b32.xlu0 %v3179_v57, %s2830_s26  ;;  %v3311_v57 = vpack.c.bf16 %v618_v25, %v617_v24  ;;  %v624_v24 = vld [vmem:[#allocation2 + $0xf8] sm:$0xff] }
  0xc6   : > { %v1380_v20 = vpop.permute.xlu1 %1379 }
  0xc7   : > { %v1460_v21 = vsel %vm891_vm3, %v1418_v19, %v1380_v20  ;;  %v1378_v22 = vpop.permute.xlu0 %1377  ;;  %v625_v20 = vld [vmem:[#allocation2 + $0x108] sm:$0xff] }
  0xc8   : > { %v1458_v28 = vsel %vm891_vm3, %v1415_v51, %v1378_v22  ;;  %1347 = vrot.lane.b32.xlu1 %v3195_v2, %s2831_s27  ;;  %v626_v51 = vld [vmem:[#allocation2 + $0x110] sm:$0xff] }
  0xc9   : > { %1345 = vrot.lane.b32.xlu0 %v3167_v50, %s2831_s27  ;;  %2615 = vmatprep.mubr.msk.bf16.mxu0 %vm931_vm4, %v1458_v28  ;;  %v623_v22 = vld [vmem:[#allocation2 + $0xf0] sm:$0xff]  ;;  %v3371_v25 = vpack.c.bf16 %v626_v51, %v625_v20 }
  0xca   : > { %2616 = vmatmul.mubr.msk.bf16.gmra.mrb[8].mxu0 %vm931_vm4, %v1460_v21  ;;  %v778_v31 = vpop.permute.xlu1 %777  ;;  %v3373_v28 = vpack.c.bf16 %v624_v24, %v623_v22 }
  0xcb   : > { %v776_v32 = vpop.permute.xlu0 %775  ;;  %v866_v23 = vsel %vm394_vm0, %v3311_v57, %v778_v31 }
  0xcc   : > { %1395 = vrot.lane.b32.xlu1 %v3204_v14, %s2830_s26  ;;  %v863_v50 = vsel %vm394_vm0, %v3293_v38, %v776_v32 }
  0xcd   : > { %1393 = vrot.lane.b32.xlu0 %v3175_v56, %s2830_s26  ;;  %v1239_v56 = vld [vmem:[#allocation2 + $0x181] sm:$0xff] }
  0xce   : > { %v826_v34 = vpop.permute.xlu1 %825  ;;  %v1256_v41 = vpack.c.bf16 %v1240_v43, %v1239_v56 }
  0xcf   : > { %v907_v35 = vsel %vm891_vm3, %v866_v23, %v826_v34  ;;  %v824_v36 = vpop.permute.xlu0 %823 }
  0xd0   : > { %v905_v63 = vsel %vm891_vm3, %v863_v50, %v824_v36  ;;  %1904 = vrot.lane.b32.xlu1 %v3191_v1, %s2831_s27 }
  0xd1   : > { %1902 = vrot.lane.b32.xlu0 %v3195_v2, %s2831_s27  ;;  %2585 = vmatprep.mubr.msk.bf16.mxu1 %vm931_vm4, %v905_v63 }
  0xd2   : > { %2586 = vmatmul.mubr.msk.bf16.gmra.mrb[12].mxu1 %vm931_vm4, %v907_v35  ;;  %v1336_v45 = vpop.permute.xlu1 %1335 }
  0xd3   : > { %v1334_v30 = vpop.permute.xlu0 %1333  ;;  %v1424_v2 = vsel %vm394_vm0, %v3329_v44, %v1336_v45 }
  0xd4   : > { %1952 = vrot.lane.b32.xlu1 %v3199_v10, %s2830_s26  ;;  %v1421_v49 = vsel %vm394_vm0, %v3311_v57, %v1334_v30  ;;  %v629_v30 = vld [vmem:[#allocation2 + $0x138] sm:$0xff] }
  0xd5   : > { %1950 = vrot.lane.b32.xlu0 %v3204_v14, %s2830_s26  ;;  %v1796_v14 = vld [vmem:[#allocation2 + $0x199] sm:$0xff] }
  0xd6   : > { %v1384_v48 = vpop.permute.xlu1 %1383  ;;  %v1813_v0 = vpack.c.bf16 %v1797_v40, %v1796_v14 }
  0xd7   : > { %v1464_v52 = vsel %vm891_vm3, %v1424_v2, %v1384_v48  ;;  %v1382_v53 = vpop.permute.xlu0 %1381  ;;  %v628_v2 = vld [vmem:[#allocation2 + $0x128] sm:$0xff] }
  0xd8   : > { %v1462_v58 = vsel %vm891_vm3, %v1421_v49, %v1382_v53  ;;  %1351 = vrot.lane.b32.xlu1 %v1256_v41, %s2831_s27  ;;  %v3393_v49 = vpack.c.bf16 %v628_v2, %v627_v47 }
  0xd9   : > { %1349 = vrot.lane.b32.xlu0 %v3191_v1, %s2831_s27  ;;  %2619 = vmatprep.mubr.msk.bf16.mxu0 %vm931_vm4, %v1462_v58 }
  0xda   : > { %2620 = vmatmul.mubr.msk.bf16.gmra.mrb[12].mxu0 %vm931_vm4, %v1464_v52  ;;  %v782_v61 = vpop.permute.xlu1 %781 }
  0xdb   : > { %v780_v62 = vpop.permute.xlu0 %779  ;;  %v872_v1 = vsel %vm394_vm0, %v3346_v60, %v782_v61 }
  0xdc   : > { %1399 = vrot.lane.b32.xlu1 %v1304_v59, %s2830_s26  ;;  %v869_v6 = vsel %vm394_vm0, %v3329_v44, %v780_v62 }
  0xdd   : > { %1397 = vrot.lane.b32.xlu0 %v3199_v10, %s2830_s26 }
  0xde   : > { %v830_v5 = vpop.permute.xlu1 %829 }
  0xdf   : > { %v911_v7 = vsel %vm891_vm3, %v872_v1, %v830_v5  ;;  %v828_v39 = vpop.permute.xlu0 %827  ;;  %v633_v1 = vld [vmem:[#allocation2 + $0x168] sm:$0xff]  ;;  %v634_v5 = vld [vmem:[#allocation2 + $0x170] sm:$0xff] }
  0xe0   : > { %v909_v8 = vsel %vm891_vm3, %v869_v6, %v828_v39  ;;  %1908 = vrot.lane.b32.xlu1 %v1813_v0, %s2831_s27  ;;  %v632_v39 = vld [vmem:[#allocation2 + $0x158] sm:$0xff] }
  0xe1   : > { %1906 = vrot.lane.b32.xlu0 %v1256_v41, %s2831_s27  ;;  %2589 = vmatprep.mubr.msk.bf16.mxu1 %vm931_vm4, %v909_v8  ;;  %v630_v41 = vld [vmem:[#allocation2 + $0x140] sm:$0xff]  ;;  %v3411_v8 = vpack.c.bf16 %v634_v5, %v633_v1 }
  0xe2   : > { %2590 = vmatmul.mubr.msk.bf16.gmra.mrb[16].mxu1 %vm931_vm4, %v911_v7  ;;  %v1881_v10 = vpop.permute.xlu1 %1880  ;;  %v3391_v48 = vpack.c.bf16 %v630_v41, %v629_v30  ;;  %v631_v7 = vld [vmem:[#allocation2 + $0x150] sm:$0xff] }
  0xe3   : > { %v1879_v11 = vpop.permute.xlu0 %1878  ;;  %v1963_v15 = vsel %vm394_vm0, %v3239_v26, %v1881_v10 }
  0xe4   : > { %1956 = vrot.lane.b32.xlu1 %v1861_v9, %s2830_s26  ;;  %v1960_v17 = vsel %vm394_vm0, %v3219_v27, %v1879_v11  ;;  %v3413_v9 = vpack.c.bf16 %v632_v39, %v631_v7 }
  0xe5   : > { %1954 = vrot.lane.b32.xlu0 %v1304_v59, %s2830_s26 }
  0xe6   : > { %v1929_v16 = vpop.permute.xlu1 %1928 }
  0xe7   : > { %v2009_v18 = vsel %vm891_vm3, %v1963_v15, %v1929_v16  ;;  %v1927_v19 = vpop.permute.xlu0 %1926 }
  0xe8   : > { %v2007_v21 = vsel %vm891_vm3, %v1960_v17, %v1927_v19 }
  0xe9   : > { %2641 = vmatprep.mubr.msk.bf16.mxu0 %vm931_vm4, %v2007_v21 }
  0xea   : > { %2642 = vmatmul.mubr.msk.bf16.vlgmr.msra.gmra.mrb[0].mxu0 %vm931_vm4, %v2009_v18  ;;  %v786_v26 = vpop.permute.xlu1 %785 }
  0xeb   : > { %v784_v31 = vpop.permute.xlu0 %783  ;;  %v878_v27 = vsel %vm394_vm0, %v3371_v25, %v786_v26 }
  0xec   : > { %v875_v23 = vsel %vm394_vm0, %v3373_v28, %v784_v31 }
  0xee   : > { %v834_v32 = vpop.permute.xlu1 %833 }
  0xef   : > { %v915_v34 = vsel %vm891_vm3, %v878_v27, %v834_v32  ;;  %v832_v50 = vpop.permute.xlu0 %831 }
  0xf0   : > { %v913_v35 = vsel %vm891_vm3, %v875_v23, %v832_v50 }
  0xf1   : > { %2593 = vmatprep.mubr.msk.bf16.mxu1 %vm931_vm4, %v913_v35 }
  0xf2   : > { %2594 = vmatmul.mubr.msk.bf16.gmra.mrb[20].mxu1 %vm931_vm4, %v915_v34  ;;  %v1885_v36 = vpop.permute.xlu1 %1884 }
  0xf3   : > { %v1883_v37 = vpop.permute.xlu0 %1882  ;;  %v1969_v42 = vsel %vm394_vm0, %v3275_v46, %v1885_v36 }
  0xf4   : > { %v1966_v56 = vsel %vm394_vm0, %v3257_v33, %v1883_v37 }
  0xf6   : > { %v1933_v63 = vpop.permute.xlu1 %1932 }
  0xf7   : > { %v2013_v43 = vsel %vm891_vm3, %v1969_v42, %v1933_v63  ;;  %v1931_v45 = vpop.permute.xlu0 %1930 }
  0xf8   : > { %v2011_v29 = vsel %vm891_vm3, %v1966_v56, %v1931_v45 }
  0xf9   : > { %2645 = vmatprep.mubr.msk.bf16.mxu0 %vm931_vm4, %v2011_v29 }
  0xfa   : > { %2646 = vmatmul.mubr.msk.bf16.gmra.mrb[4].mxu0 %vm931_vm4, %v2013_v43  ;;  %v790_v46 = vpop.permute.xlu1 %789 }
  0xfb   : > { %v788_v52 = vpop.permute.xlu0 %787  ;;  %v884_v33 = vsel %vm394_vm0, %v3391_v48, %v790_v46 }
  0xfc   : > { %v881_v54 = vsel %vm394_vm0, %v3393_v49, %v788_v52 }
  0xfe   : > { %v838_v53 = vpop.permute.xlu1 %837 }
  0xff   : > { %v919_v55 = vsel %vm891_vm3, %v884_v33, %v838_v53  ;;  %v836_v58 = vpop.permute.xlu0 %835 }
 0x100   : > { %v917_v59 = vsel %vm891_vm3, %v881_v54, %v836_v58 }
 0x101   : > { %2597 = vmatprep.mubr.msk.bf16.mxu1 %vm931_vm4, %v917_v59 }
 0x102   : > { %2598 = vmatmul.mubr.msk.bf16.gmra.mrb[24].mxu1 %vm931_vm4, %v919_v55  ;;  %v1889_v14 = vpop.permute.xlu1 %1888 }
 0x103   : > { %v1887_v40 = vpop.permute.xlu0 %1886  ;;  %v1975_v61 = vsel %vm394_vm0, %v3311_v57, %v1889_v14 }
 0x104   : > { %v1972_v0 = vsel %vm394_vm0, %v3293_v38, %v1887_v40 }
 0x106   : > { %v1937_v62 = vpop.permute.xlu1 %1936 }
 0x107   : > { %v2017_v3 = vsel %vm891_vm3, %v1975_v61, %v1937_v62  ;;  %v1935_v4 = vpop.permute.xlu0 %1934 }
 0x108   : > { %v2015_v6 = vsel %vm891_vm3, %v1972_v0, %v1935_v4 }
 0x109   : > { %2649 = vmatprep.mubr.msk.bf16.mxu0 %vm931_vm4, %v2015_v6 }
 0x10a   : > { %2650 = vmatmul.mubr.msk.bf16.gmra.mrb[8].mxu0 %vm931_vm4, %v2017_v3  ;;  %v794_v57 = vpop.permute.xlu1 %793 }
 0x10b   : > { %v792_v10 = vpop.permute.xlu0 %791  ;;  %v890_v38 = vsel %vm394_vm0, %v3411_v8, %v794_v57 }
 0x10c   : > { %v887_v15 = vsel %vm394_vm0, %v3413_v9, %v792_v10 }
 0x10e   : > { %v842_v11 = vpop.permute.xlu1 %841 }
 0x10f   : > { %v923_v16 = vsel %vm891_vm3, %v890_v38, %v842_v11  ;;  %v840_v17 = vpop.permute.xlu0 %839  ;;  %v1191_v11 = vld [vmem:[#allocation2 + $0x180] sm:$0xff] }
 0x110   : > { %v921_v18 = vsel %vm891_vm3, %v887_v15, %v840_v17  ;;  %v1192_v15 = vld [vmem:[#allocation2 + $0x188] sm:$0xff] }
 0x111   : > { %2601 = vmatprep.mubr.msk.bf16.mxu1 %vm931_vm4, %v921_v18  ;;  %v1208_v17 = vpack.c.bf16 %v1192_v15, %v1191_v11  ;;  %v539_v11 = vld [vmem:[%s2951_s25 + $0x38] sm:$0xff] }
 0x112   : > { %2602 = vmatmul.mubr.msk.bf16.gmra.mrb[28].mxu1 %vm931_vm4, %v923_v16  ;;  %v1893_v19 = vpop.permute.xlu1 %1892 }
 0x113   : > { %v1891_v20 = vpop.permute.xlu0 %1890  ;;  %v1981_v51 = vsel %vm394_vm0, %v3346_v60, %v1893_v19 }
 0x114   : > { %v1978_v22 = vsel %vm394_vm0, %v3329_v44, %v1891_v20 }
 0x116   : > { %v1941_v21 = vpop.permute.xlu1 %1940 }
 0x117   : > { %v2021_v24 = vsel %vm891_vm3, %v1981_v51, %v1941_v21  ;;  %v1939_v26 = vpop.permute.xlu0 %1938 }
 0x118   : > { %v2019_v31 = vsel %vm891_vm3, %v1978_v22, %v1939_v26  ;;  %v1749_v26 = vld [vmem:[#allocation2 + $0x1a0] sm:$0xff] }
 0x119   : > { %2653 = vmatprep.mubr.msk.bf16.mxu0 %vm931_vm4, %v2019_v31 }
 0x11a   : > { %2654 = vmatmul.mubr.msk.bf16.gmra.mrb[12].mxu0 %vm931_vm4, %v2021_v24  ;;  %v1340_v27 = vpop.permute.xlu1 %1339  ;;  %v1748_v24 = vld [vmem:[#allocation2 + $0x198] sm:$0xff] }
 0x11b   : > { %v1338_v32 = vpop.permute.xlu0 %1337  ;;  %v1430_v23 = vsel %vm394_vm0, %v3373_v28, %v1340_v27  ;;  %v1765_v27 = vpack.c.bf16 %v1749_v26, %v1748_v24 }
 0x11c   : > { %v1427_v50 = vsel %vm394_vm0, %v3346_v60, %v1338_v32 }
 0x11e   : > { %v1388_v34 = vpop.permute.xlu1 %1387 }
 0x11f   : > { %v1468_v44 = vsel %vm891_vm3, %v1430_v23, %v1388_v34  ;;  %v1386_v35 = vpop.permute.xlu0 %1385 }
 0x120   : > { %v1466_v36 = vsel %vm891_vm3, %v1427_v50, %v1386_v35 }
 0x121   : > { %2623 = vmatprep.mubr.msk.bf16.mxu1 %vm931_vm4, %v1466_v36 }
 0x122   : > { %2624 = vmatmul.mubr.msk.bf16.vlgmr.msra.gmra.mrb[16].mxu1 %vm931_vm4, %v1468_v44  ;;  %v1897_v37 = vpop.permute.xlu1 %1896 }
 0x123   : > { %v1895_v42 = vpop.permute.xlu0 %1894  ;;  %v1987_v63 = vsel %vm394_vm0, %v3371_v25, %v1897_v37 }
 0x124   : > { %v1984_v43 = vsel %vm394_vm0, %v3373_v28, %v1895_v42 }
 0x126   : > { %v1945_v56 = vpop.permute.xlu1 %1944 }
 0x127   : > { %v2025_v60 = vsel %vm891_vm3, %v1987_v63, %v1945_v56  ;;  %v1943_v45 = vpop.permute.xlu0 %1942 }
 0x128   : > { %v2023_v30 = vsel %vm891_vm3, %v1984_v43, %v1943_v45 }
 0x129   : > { %2657 = vmatprep.mubr.msk.bf16.mxu0 %vm931_vm4, %v2023_v30 }
 0x12a   : > { %2658 = vmatmul.mubr.msk.bf16.gmra.mrb[16].mxu0 %vm931_vm4, %v2025_v60  ;;  %v1344_v41 = vpop.permute.xlu1 %1343 }
 0x12b   : > { %v1342_v29 = vpop.permute.xlu0 %1341  ;;  %v1436_v47 = vsel %vm394_vm0, %v3393_v49, %v1344_v41 }
 0x12c   : > { %v1433_v46 = vsel %vm394_vm0, %v3371_v25, %v1342_v29 }
 0x12e   : > { %v1392_v2 = vpop.permute.xlu1 %1391 }
 0x12f   : > { %v1472_v28 = vsel %vm891_vm3, %v1436_v47, %v1392_v2  ;;  %v1390_v52 = vpop.permute.xlu0 %1389 }
 0x130   : > { %v1470_v33 = vsel %vm891_vm3, %v1433_v46, %v1390_v52 }
 0x131   : > { %2627 = vmatprep.mubr.msk.bf16.mxu1 %vm931_vm4, %v1470_v33 }
 0x132   : > { %2628 = vmatmul.mubr.msk.bf16.gmra.mrb[20].mxu1 %vm931_vm4, %v1472_v28  ;;  %v1901_v53 = vpop.permute.xlu1 %1900 }
 0x133   : > { %v1899_v54 = vpop.permute.xlu0 %1898  ;;  %v1993_v55 = vsel %vm394_vm0, %v3391_v48, %v1901_v53  ;;  %v534_v53 = vld [vmem:[%s2951_s25 + $0x10] sm:$0xff] }
 0x134   : > { %v1990_v59 = vsel %vm394_vm0, %v3393_v49, %v1899_v54  ;;  %v3512_v54 = vld [vmem:[%s3669_s4] ss:$0 sm:$0xff] }
 0x136   : > { %v1949_v58 = vpop.permute.xlu1 %1948 }
 0x137   : > { %v2029_v25 = vsel %vm891_vm3, %v1993_v55, %v1949_v58  ;;  %v1947_v14 = vpop.permute.xlu0 %1946  ;;  %v532_v55 = vld [vmem:[%s2951_s25] sm:$0xff]  ;;  %v535_v58 = vld [vmem:[%s2951_s25 + $0x18] sm:$0xff] }
 0x138   : > { %v2027_v40 = vsel %vm891_vm3, %v1990_v59, %v1947_v14  ;;  %v573_v59 = vadd.f32 %v3512_v54, %v534_v53  ;;  %v571_v14 = vadd.f32 %v3512_v54, %v532_v55 }
 0x139   : > { %2661 = vmatprep.mubr.msk.bf16.mxu0 %vm931_vm4, %v2027_v40  ;;  %v574_v40 = vadd.f32 %v3512_v54, %v535_v58 }
 0x13a   : > { %2662 = vmatmul.mubr.msk.bf16.gmra.mrb[20].mxu0 %vm931_vm4, %v2029_v25  ;;  %v1348_v61 = vpop.permute.xlu1 %1347  ;;  %v533_v25 = vld [vmem:[%s2951_s25 + $0x8] sm:$0xff] }
 0x13b   : > { %v1346_v62 = vpop.permute.xlu0 %1345  ;;  %v1442_v0 = vsel %vm394_vm0, %v3413_v9, %v1348_v61  ;;  %v572_v61 = vadd.f32 %v3512_v54, %v533_v25 }
 0x13c   : > { %v1439_v4 = vsel %vm394_vm0, %v3391_v48, %v1346_v62 }
 0x13e   : > { %v1396_v3 = vpop.permute.xlu1 %1395 }
 0x13f   : > { %v1476_v49 = vsel %vm891_vm3, %v1442_v0, %v1396_v3  ;;  %v1394_v1 = vpop.permute.xlu0 %1393 }
 0x140   : > { %v1474_v5 = vsel %vm891_vm3, %v1439_v4, %v1394_v1 }
 0x141   : > { %2631 = vmatprep.mubr.msk.bf16.mxu1 %vm931_vm4, %v1474_v5 }
 0x142   : > { %2632 = vmatmul.mubr.msk.bf16.gmra.mrb[24].mxu1 %vm931_vm4, %v1476_v49  ;;  %v1905_v6 = vpop.permute.xlu1 %1904 }
 0x143   : > { %v1903_v7 = vpop.permute.xlu0 %1902  ;;  %v1999_v39 = vsel %vm394_vm0, %v3411_v8, %v1905_v6 }
 0x144   : > { %v1996_v10 = vsel %vm394_vm0, %v3413_v9, %v1903_v7 }
 0x146   : > { %v1953_v57 = vpop.permute.xlu1 %1952 }
 0x147   : > { %v2033_v48 = vsel %vm891_vm3, %v1999_v39, %v1953_v57  ;;  %v1951_v38 = vpop.permute.xlu0 %1950 }
 0x148   : > { %v2031_v16 = vsel %vm891_vm3, %v1996_v10, %v1951_v38  ;;  %v536_v38 = vld [vmem:[%s2951_s25 + $0x20] sm:$0xff] }
 0x149   : > { %2665 = vmatprep.mubr.msk.bf16.mxu0 %vm931_vm4, %v2031_v16  ;;  %v537_v16 = vld [vmem:[%s2951_s25 + $0x28] sm:$0xff] }
 0x14a   : > { %2666 = vmatmul.mubr.msk.bf16.gmra.mrb[24].mxu0 %vm931_vm4, %v2033_v48  ;;  %v1352_v18 = vpop.permute.xlu1 %1351  ;;  %v538_v48 = vld [vmem:[%s2951_s25 + $0x30] sm:$0xff] }
 0x14b   : > { %v1350_v19 = vpop.permute.xlu0 %1349  ;;  %v1448_v20 = vsel %vm394_vm0, %v1208_v17, %v1352_v18  ;;  %v577_v15 = vadd.f32 %v3512_v54, %v538_v48  ;;  %v578_v18 = vadd.f32 %v3512_v54, %v539_v11  ;;  %v548_v11 = vld [vmem:[%s2951_s25 + $0x80] sm:$0xff] }
 0x14c   : > { %v1445_v9 = vsel %vm394_vm0, %v3411_v8, %v1350_v19  ;;  %v576_v19 = vadd.f32 %v3512_v54, %v537_v16  ;;  %v551_v16 = vld [vmem:[%s2951_s25 + $0x98] sm:$0xff] }
 0x14e   : > { %v1400_v51 = vpop.permute.xlu1 %1399 }
 0x14f   : > { %v1480_v21 = vsel %vm891_vm3, %v1448_v20, %v1400_v51  ;;  %v1398_v22 = vpop.permute.xlu0 %1397 }
 0x150   : > { %v1478_v31 = vsel %vm891_vm3, %v1445_v9, %v1398_v22 }
 0x151   : > { %2635 = vmatprep.mubr.msk.bf16.mxu1 %vm931_vm4, %v1478_v31 }
 0x152   : > { %2636 = vmatmul.mubr.msk.bf16.gmra.mrb[28].mxu1 %vm931_vm4, %v1480_v21  ;;  %v1909_v32 = vpop.permute.xlu1 %1908 }
 0x153   : > { %v1907_v23 = vpop.permute.xlu0 %1906  ;;  %v2005_v34 = vsel %vm394_vm0, %v1765_v27, %v1909_v32 }
 0x154   : > { %v2002_v44 = vsel %vm394_vm0, %v1208_v17, %v1907_v23  ;;  %v575_v17 = vadd.f32 %v3512_v54, %v536_v38 }
 0x156   : > { %v1957_v50 = vpop.permute.xlu1 %1956 }
 0x157   : > { %v2037_v8 = vsel %vm891_vm3, %v2005_v34, %v1957_v50  ;;  %v1955_v35 = vpop.permute.xlu0 %1954  ;;  %v542_v50 = vld [vmem:[%s2951_s25 + $0x50] sm:$0xff] }
 0x158   : > { %v2035_v36 = vsel %vm891_vm3, %v2002_v44, %v1955_v35  ;;  %v540_v44 = vld [vmem:[%s2951_s25 + $0x40] sm:$0xff]  ;;  %v581_v35 = vadd.f32 %v3512_v54, %v542_v50 }
 0x159   : > { %2669 = vmatprep.mubr.msk.bf16.mxu0 %vm931_vm4, %v2035_v36  ;;  %v541_v36 = vld [vmem:[%s2951_s25 + $0x48] sm:$0xff] }
 0x15a   : > { %2670 = vmatmul.mubr.msk.bf16.gmra.mrb[28].mxu0 %vm931_vm4, %v2037_v8  ;;  %v543_v8 = vld [vmem:[%s2951_s25 + $0x58] sm:$0xff] }
 0x175   : > { %v2575_v37 = vpop.f32.mrb[0].mxu1 }
 0x176   : > { %v1002_v42 = vpop.f32.mrb[1].mxu1  ;;  %v1131_v62 = vadd.f32 %v2575_v37, %v573_v59  ;;  %v579_v37 = vadd.f32 %v3512_v54, %v540_v44 }
 0x177   : > { %v2576_v63 = vpop.f32.mrb[2].mxu1  ;;  %v1129_v0 = vadd.f32 %v1002_v42, %v571_v14  ;;  %v582_v42 = vadd.f32 %v3512_v54, %v543_v8 }
 0x178   : > { %v1005_v56 = vpop.f32.mrb[3].mxu1  ;;  %v1132_v4 = vadd.f32 %v2576_v63, %v574_v40  ;;  %v580_v63 = vadd.f32 %v3512_v54, %v541_v36  ;;  %v547_v40 = vld [vmem:[%s2951_s25 + $0x78] sm:$0xff] }
 0x179   : > { %v1130_v5 = vadd.f32 %v1005_v56, %v572_v61 }
 0x185   : > { %v2579_v43 = vpop.f32.mrb[4].mxu1 }
 0x186   : > { %v1018_v60 = vpop.f32.mrb[5].mxu1  ;;  %v1135_v20 = vadd.f32 %v2579_v43, %v577_v15 }
 0x187   : > { %v2580_v45 = vpop.f32.mrb[6].mxu1  ;;  %v1133_v51 = vadd.f32 %v1018_v60, %v575_v17 }
 0x188   : > { %v1021_v30 = vpop.f32.mrb[7].mxu1  ;;  %v1136_v21 = vadd.f32 %v2580_v45, %v578_v18  ;;  %v549_v18 = vld [vmem:[%s2951_s25 + $0x88] sm:$0xff] }
 0x189   : > { %v1134_v26 = vadd.f32 %v1021_v30, %v576_v19 }
 0x195   : > { %v3492_v41 = vpop.f32.mrb[8].mxu1 }
 0x196   : > { %v3494_v29 = vpop.f32.mrb[9].mxu1  ;;  %v1139_v56 = vadd.f32 %v3492_v41, %v581_v35  ;;  %v554_v35 = vld [vmem:[%s2951_s25 + $0xb0] sm:$0xff] }
 0x197   : > { %v3496_v47 = vpop.f32.mrb[10].mxu1  ;;  %v1137_v43 = vadd.f32 %v3494_v29, %v579_v37  ;;  %v546_v29 = vld [vmem:[%s2951_s25 + $0x70] sm:$0xff]  ;;  %v552_v37 = vld [vmem:[%s2951_s25 + $0xa0] sm:$0xff] }
 0x198   : > { %v3498_v2 = vpop.f32.mrb[11].mxu1  ;;  %v1140_v45 = vadd.f32 %v3496_v47, %v582_v42  ;;  %v544_v47 = vld [vmem:[%s2951_s25 + $0x60] sm:$0xff]  ;;  %v585_v61 = vadd.f32 %v3512_v54, %v546_v29 }
 0x199   : > { %v1138_v55 = vadd.f32 %v3498_v2, %v580_v63  ;;  %v545_v2 = vld [vmem:[%s2951_s25 + $0x68] sm:$0xff]  ;;  %v555_v63 = vld [vmem:[%s2951_s25 + $0xb8] sm:$0xff] }
 0x1a5   : > { %v3500_v46 = vpop.f32.mrb[12].mxu1 }
 0x1a6   : > { %v3502_v28 = vpop.f32.mrb[13].mxu1 }
 0x1a7   : > { %v3504_v52 = vpop.f32.mrb[14].mxu1 }
 0x1a8   : > { %v3506_v33 = vpop.f32.mrb[15].mxu1 }
 0x1bd   : > { %v2643_v3 = vpop.f32.mrb[0].mxu0 }
 0x1be   : > { %v2676_v49 = vadd.f32 %v2643_v3, %v1131_v62  ;;  %v2115_v1 = vpop.f32.mrb[1].mxu0  ;;  %v583_v62 = vadd.f32 %v3512_v54, %v544_v47  ;;  %v584_v3 = vadd.f32 %v3512_v54, %v545_v2 }
 0x1bf   : > { %v2678_v6 = vadd.f32 %v2115_v1, %v1129_v0  ;;  %v2644_v7 = vpop.f32.mrb[2].mxu0  ;;  %v586_v0 = vadd.f32 %v3512_v54, %v547_v40 }
 0x1c0   : > { %2276 = vst.msk [vmem:[%s3526_s11 + $0x10] sm:$0xff] %vm394_vm0, %v2676_v49  ;;  %v2680_v39 = vadd.f32 %v2644_v7, %v1132_v4  ;;  %v2118_v57 = vpop.f32.mrb[3].mxu0  ;;  %v1143_v4 = vadd.f32 %v3500_v46, %v585_v61  ;;  %v1141_v49 = vadd.f32 %v3502_v28, %v583_v62  ;;  %v550_v28 = vld [vmem:[%s2951_s25 + $0x90] sm:$0xff] }
 0x1c1   : > { %2274 = vst.msk [vmem:[%s3526_s11] sm:$0xff] %vm394_vm0, %v2678_v6  ;;  %v2682_v10 = vadd.f32 %v2118_v57, %v1130_v5  ;;  %v1144_v5 = vadd.f32 %v3504_v52, %v586_v0  ;;  %v589_v17 = vadd.f32 %v3512_v54, %v550_v28 }
 0x1c2   : > { %2277 = vst.msk [vmem:[%s3526_s11 + $0x18] sm:$0xff] %vm394_vm0, %v2680_v39  ;;  %v1142_v39 = vadd.f32 %v3506_v33, %v584_v3  ;;  %v558_v3 = vld [vmem:[%s2951_s25 + $0xd0] sm:$0xff] }
 0x1c3   : > { %2275 = vst.msk [vmem:[%s3526_s11 + $0x8] sm:$0xff] %vm394_vm0, %v2682_v10 }
 0x1cd   : > { %v2647_v9 = vpop.f32.mrb[4].mxu0 }
 0x1ce   : > { %v2684_v22 = vadd.f32 %v2647_v9, %v1135_v20  ;;  %v2131_v24 = vpop.f32.mrb[5].mxu0  ;;  %v587_v20 = vadd.f32 %v3512_v54, %v548_v11  ;;  %v588_v9 = vadd.f32 %v3512_v54, %v549_v18 }
 0x1cf   : > { %v2686_v31 = vadd.f32 %v2131_v24, %v1133_v51  ;;  %v2648_v27 = vpop.f32.mrb[6].mxu0  ;;  %v590_v51 = vadd.f32 %v3512_v54, %v551_v16 }
 0x1d0   : > { %2280 = vst.msk [vmem:[%s3526_s11 + $0x30] sm:$0xff] %vm394_vm0, %v2684_v22  ;;  %v2688_v32 = vadd.f32 %v2648_v27, %v1136_v21  ;;  %v2134_v23 = vpop.f32.mrb[7].mxu0 }
 0x1d1   : > { %2278 = vst.msk [vmem:[%s3526_s11 + $0x20] sm:$0xff] %vm394_vm0, %v2686_v31  ;;  %v2690_v34 = vadd.f32 %v2134_v23, %v1134_v26 }
 0x1d2   : > { %2281 = vst.msk [vmem:[%s3526_s11 + $0x38] sm:$0xff] %vm394_vm0, %v2688_v32 }
 0x1d3   : > { %2279 = vst.msk [vmem:[%s3526_s11 + $0x28] sm:$0xff] %vm394_vm0, %v2690_v34 }
 0x1dd   : > { %v2651_v60 = vpop.f32.mrb[8].mxu0 }
 0x1de   : > { %v2692_v30 = vadd.f32 %v2651_v60, %v1139_v56  ;;  %v2147_v53 = vpop.f32.mrb[9].mxu0  ;;  %v553_v60 = vld [vmem:[%s2951_s25 + $0xa8] sm:$0xff] }
 0x1df   : > { %v2694_v58 = vadd.f32 %v2147_v53, %v1137_v43  ;;  %v2652_v59 = vpop.f32.mrb[10].mxu0  ;;  %v593_v43 = vadd.f32 %v3512_v54, %v554_v35  ;;  %v594_v53 = vadd.f32 %v3512_v54, %v555_v63 }
 0x1e0   : > { %2284 = vst.msk [vmem:[%s3526_s11 + $0x50] sm:$0xff] %vm394_vm0, %v2692_v30  ;;  %v2696_v25 = vadd.f32 %v2652_v59, %v1140_v45  ;;  %v2150_v14 = vpop.f32.mrb[11].mxu0  ;;  %v591_v30 = vadd.f32 %v3512_v54, %v552_v37 }
 0x1e1   : > { %2282 = vst.msk [vmem:[%s3526_s11 + $0x40] sm:$0xff] %vm394_vm0, %v2694_v58  ;;  %v2698_v41 = vadd.f32 %v2150_v14, %v1138_v55  ;;  %v592_v55 = vadd.f32 %v3512_v54, %v553_v60 }
 0x1e2   : > { %2285 = vst.msk [vmem:[%s3526_s11 + $0x58] sm:$0xff] %vm394_vm0, %v2696_v25 }
 0x1e3   : > { %2283 = vst.msk [vmem:[%s3526_s11 + $0x48] sm:$0xff] %vm394_vm0, %v2698_v41 }
 0x1ed   : > { %v2655_v1 = vpop.f32.mrb[12].mxu0 }
 0x1ee   : > { %v2700_v6 = vadd.f32 %v2655_v1, %v1143_v4  ;;  %v2163_v7 = vpop.f32.mrb[13].mxu0 }
 0x1ef   : > { %v2702_v57 = vadd.f32 %v2163_v7, %v1141_v49  ;;  %v2656_v10 = vpop.f32.mrb[14].mxu0  ;;  %v556_v49 = vld [vmem:[%s2951_s25 + $0xc0] sm:$0xff]  ;;  %v597_v7 = vadd.f32 %v3512_v54, %v558_v3 }
 0x1f0   : > { %2288 = vst.msk [vmem:[%s3526_s11 + $0x70] sm:$0xff] %vm394_vm0, %v2700_v6  ;;  %v2704_v48 = vadd.f32 %v2656_v10, %v1144_v5  ;;  %v2166_v38 = vpop.f32.mrb[15].mxu0  ;;  %v559_v5 = vld [vmem:[%s2951_s25 + $0xd8] sm:$0xff]  ;;  %v595_v10 = vadd.f32 %v3512_v54, %v556_v49 }
 0x1f1   : > { %2286 = vst.msk [vmem:[%s3526_s11 + $0x60] sm:$0xff] %vm394_vm0, %v2702_v57  ;;  %v2706_v46 = vadd.f32 %v2166_v38, %v1142_v39  ;;  %v557_v39 = vld [vmem:[%s2951_s25 + $0xc8] sm:$0xff] }
 0x1f2   : > { %2289 = vst.msk [vmem:[%s3526_s11 + $0x78] sm:$0xff] %vm394_vm0, %v2704_v48  ;;  %v598_v48 = vadd.f32 %v3512_v54, %v559_v5  ;;  %v596_v38 = vadd.f32 %v3512_v54, %v557_v39 }
 0x1f3   : > { %2287 = vst.msk [vmem:[%s3526_s11 + $0x68] sm:$0xff] %vm394_vm0, %v2706_v46 }
 0x1f5   : > { %v2625_v52 = vpop.f32.mrb[16].mxu1 }
 0x1f6   : > { %v1622_v15 = vpop.f32.mrb[17].mxu1  ;;  %v2707_v21 = vadd.f32 %v2625_v52, %v589_v17 }
 0x1f7   : > { %v2626_v33 = vpop.f32.mrb[18].mxu1  ;;  %v2709_v22 = vadd.f32 %v1622_v15, %v587_v20 }
 0x1f8   : > { %v1625_v19 = vpop.f32.mrb[19].mxu1  ;;  %v2711_v26 = vadd.f32 %v2626_v33, %v590_v51 }
 0x1f9   : > { %v2713_v32 = vadd.f32 %v1625_v19, %v588_v9 }
 0x1fd   : > { %v2659_v24 = vpop.f32.mrb[16].mxu0 }
 0x1fe   : > { %v2708_v31 = vadd.f32 %v2707_v21, %v2659_v24  ;;  %v2179_v27 = vpop.f32.mrb[17].mxu0  ;;  %v560_v21 = vld [vmem:[%s2951_s25 + $0xe0] sm:$0xff] }
 0x1ff   : > { %v2710_v23 = vadd.f32 %v2709_v22, %v2179_v27  ;;  %v2660_v34 = vpop.f32.mrb[18].mxu0 }
 0x200   : > { %2292 = vst.msk [vmem:[%s3526_s11 + $0x90] sm:$0xff] %vm394_vm0, %v2708_v31  ;;  %v2712_v50 = vadd.f32 %v2711_v26, %v2660_v34  ;;  %v2182_v44 = vpop.f32.mrb[19].mxu0  ;;  %v601_v26 = vadd.f32 %v3512_v54, %v3075_v12  ;;  %v561_v31 = vld [vmem:[%s2951_s25 + $0xe8] sm:$0xff] }
 0x201   : > { %2290 = vst.msk [vmem:[%s3526_s11 + $0x80] sm:$0xff] %vm394_vm0, %v2710_v23  ;;  %v2714_v8 = vadd.f32 %v2713_v32, %v2182_v44  ;;  %v599_v32 = vadd.f32 %v3512_v54, %v560_v21  ;;  %v602_v23 = vadd.f32 %v3512_v54, %v3078_v13  ;;  %v600_v34 = vadd.f32 %v3512_v54, %v561_v31 }
 0x202   : > { %2293 = vst.msk [vmem:[%s3526_s11 + $0x98] sm:$0xff] %vm394_vm0, %v2712_v50 }
 0x203   : > { %2291 = vst.msk [vmem:[%s3526_s11 + $0x88] sm:$0xff] %vm394_vm0, %v2714_v8 }
 0x205   : > { %v2629_v36 = vpop.f32.mrb[20].mxu1 }
 0x206   : > { %v1638_v42 = vpop.f32.mrb[21].mxu1  ;;  %v2715_v58 = vadd.f32 %v2629_v36, %v593_v43 }
 0x207   : > { %v2630_v56 = vpop.f32.mrb[22].mxu1  ;;  %v2717_v59 = vadd.f32 %v1638_v42, %v591_v30 }
 0x208   : > { %v1641_v45 = vpop.f32.mrb[23].mxu1  ;;  %v2719_v14 = vadd.f32 %v2630_v56, %v594_v53 }
 0x209   : > { %v2721_v47 = vadd.f32 %v1641_v45, %v592_v55 }
 0x20d   : > { %v2663_v25 = vpop.f32.mrb[20].mxu0 }
 0x20e   : > { %v2716_v41 = vadd.f32 %v2715_v58, %v2663_v25  ;;  %v2195_v29 = vpop.f32.mrb[21].mxu0 }
 0x20f   : > { %v2718_v40 = vadd.f32 %v2717_v59, %v2195_v29  ;;  %v2664_v61 = vpop.f32.mrb[22].mxu0 }
 0x210   : > { %2296 = vst.msk [vmem:[%s3526_s11 + $0xb0] sm:$0xff] %vm394_vm0, %v2716_v41  ;;  %v2720_v2 = vadd.f32 %v2719_v14, %v2664_v61  ;;  %v2198_v62 = vpop.f32.mrb[23].mxu0 }
 0x211   : > { %2294 = vst.msk [vmem:[%s3526_s11 + $0xa0] sm:$0xff] %vm394_vm0, %v2718_v40  ;;  %v2722_v0 = vadd.f32 %v2721_v47, %v2198_v62 }
 0x212   : > { %2297 = vst.msk [vmem:[%s3526_s11 + $0xb8] sm:$0xff] %vm394_vm0, %v2720_v2 }
 0x213   : > { %2295 = vst.msk [vmem:[%s3526_s11 + $0xa8] sm:$0xff] %vm394_vm0, %v2722_v0 }
 0x215   : > { %v2633_v4 = vpop.f32.mrb[24].mxu1 }
 0x216   : > { %v1654_v1 = vpop.f32.mrb[25].mxu1  ;;  %v2723_v46 = vadd.f32 %v2633_v4, %v597_v7 }
 0x217   : > { %v2634_v6 = vpop.f32.mrb[26].mxu1  ;;  %v2725_v28 = vadd.f32 %v1654_v1, %v595_v10 }
 0x218   : > { %v1657_v57 = vpop.f32.mrb[27].mxu1  ;;  %v2727_v11 = vadd.f32 %v2634_v6, %v598_v48 }
 0x219   : > { %v2729_v33 = vadd.f32 %v1657_v57, %v596_v38 }
 0x21d   : > { %v2667_v52 = vpop.f32.mrb[24].mxu0 }
 0x21e   : > { %v2724_v15 = vadd.f32 %v2723_v46, %v2667_v52  ;;  %v2211_v16 = vpop.f32.mrb[25].mxu0 }
 0x21f   : > { %v2726_v17 = vadd.f32 %v2725_v28, %v2211_v16  ;;  %v2668_v18 = vpop.f32.mrb[26].mxu0 }
 0x220   : > { %2300 = vst.msk [vmem:[%s3526_s11 + $0xd0] sm:$0xff] %vm394_vm0, %v2724_v15  ;;  %v2728_v19 = vadd.f32 %v2727_v11, %v2668_v18  ;;  %v2214_v20 = vpop.f32.mrb[27].mxu0 }
 0x221   : > { %2298 = vst.msk [vmem:[%s3526_s11 + $0xc0] sm:$0xff] %vm394_vm0, %v2726_v17  ;;  %v2730_v51 = vadd.f32 %v2729_v33, %v2214_v20 }
 0x222   : > { %2301 = vst.msk [vmem:[%s3526_s11 + $0xd8] sm:$0xff] %vm394_vm0, %v2728_v19 }
 0x223   : > { %2299 = vst.msk [vmem:[%s3526_s11 + $0xc8] sm:$0xff] %vm394_vm0, %v2730_v51 }
 0x225   : > { %v2637_v9 = vpop.f32.mrb[28].mxu1 }
 0x226   : > { %v1670_v22 = vpop.f32.mrb[29].mxu1  ;;  %v2731_v50 = vadd.f32 %v2637_v9, %v601_v26 }
 0x227   : > { %v2638_v24 = vpop.f32.mrb[30].mxu1  ;;  %v2733_v44 = vadd.f32 %v1670_v22, %v599_v32 }
 0x228   : > { %v1673_v27 = vpop.f32.mrb[31].mxu1  ;;  %v2735_v35 = vadd.f32 %v2638_v24, %v602_v23 }
 0x229   : > { %v2737_v42 = vadd.f32 %v1673_v27, %v600_v34 }
 0x22d   : > { %v2671_v8 = vpop.f32.mrb[28].mxu0 }
 0x22e   : > { %v2732_v36 = vadd.f32 %v2731_v50, %v2671_v8  ;;  %v2227_v37 = vpop.f32.mrb[29].mxu0 }
 0x22f   : > { %v2734_v12 = vadd.f32 %v2733_v44, %v2227_v37  ;;  %v2672_v63 = vpop.f32.mrb[30].mxu0 }
 0x230   : > { %2304 = vst.msk [vmem:[%s3526_s11 + $0xf0] sm:$0xff] %vm394_vm0, %v2732_v36  ;;  %v2736_v56 = vadd.f32 %v2735_v35, %v2672_v63  ;;  %v2230_v43 = vpop.f32.mrb[31].mxu0 }
 0x231   : > { %2302 = vst.msk [vmem:[%s3526_s11 + $0xe0] sm:$0xff] %vm394_vm0, %v2734_v12  ;;  %v2738_v13 = vadd.f32 %v2737_v42, %v2230_v43 }
 0x232   : > { %2305 = vst.msk [vmem:[%s3526_s11 + $0xf8] sm:$0xff] %vm394_vm0, %v2736_v56 }
 0x233   : > { %2303 = vst.msk [vmem:[%s3526_s11 + $0xe8] sm:$0xff] %vm394_vm0, %v2738_v13 }
 0x234 PF: > { %s15_s20 = sadd.s32 1, %s2827_s20   ;;  %s3671_s18 = smov %s2823_s19 }
 0x235   : > { %p12_p5 = scmp.ge.s32.totalorder %s15_s20, 4   ;;  %s3672_s19 = smov %s3674_s1 }
 0x237   :  { %14 = sbr.rel (!%p12_p5) target bundleno = 2 (0x2), region = 89 }

</bundles_post_ra>
